<compile_context>
chip_gen: v6e
topology: v6e:2x2x1
jax: 0.10.0
libtpu: 0.0.40
codegen_flags: <defaults>
</compile_context>

<pallas_src>
import jax
import jax.numpy as jnp
import numpy as np
from jax.experimental import pallas as pl
from jax.experimental.pallas import tpu as pltpu

_VMEM = pl.BlockSpec(memory_space=pltpu.MemorySpace.VMEM)
_SMEM = pl.BlockSpec(memory_space=pltpu.MemorySpace.SMEM)

_NORM_EPS_SQ = 1e-24  # == (1e-12)**2 ; x * rsqrt(max(ss, eps^2)) == x / max(||x||, eps)


# --------------------------- in-kernel helpers ------------------------------

def _row_normalize(x):
    ss = jnp.sum(x * x, axis=1, keepdims=True)
    return x * jax.lax.rsqrt(jnp.maximum(ss, _NORM_EPS_SQ))


def _col_normalize(x):
    ss = jnp.sum(x * x, axis=0, keepdims=True)
    return x * jax.lax.rsqrt(jnp.maximum(ss, _NORM_EPS_SQ))


def _log_softmax_rows(x):
    m = jnp.max(x, axis=1, keepdims=True)
    s = x - m
    return s - jnp.log(jnp.sum(jnp.exp(s), axis=1, keepdims=True))


def _sinkhorn_target(sim, alpha, n_iter, row_mask=None):
    """Pruned Sinkhorn-Knopp.

    The reference's global Q /= sum(Q), the constant /K and /B divides and the
    trailing *B cancel exactly into the adjacent per-axis normalizations, so
    each iteration is just two reductions + two divides (exact up to fp
    reassociation).  sim is (B, K); our Q[b, k] == torch Q[k, b] (post .t()).
    `row_mask` zeroes padded sample rows so they never pollute the column sums.
    """
    Q = jnp.exp(alpha * sim)
    if row_mask is not None:
        Q = Q * row_mask
    for _ in range(n_iter):
        Q = Q / jnp.sum(Q, axis=0, keepdims=True)   # per-cluster ("sum_of_rows")
        r = jnp.sum(Q, axis=1, keepdims=True)       # per-sample
        if row_mask is not None:
            r = jnp.where(r > 0.0, r, 1.0)          # guard padded rows (sum==0)
        Q = Q / r
    return Q


# --------------------------- fused Pallas kernel -----------------------------

def _make_fused_kernel(np_valid, np_pad, nu_valid, nu_pad, nn_valid, nn_pad,
                       K, P, alpha, temp, tau, lambda_n, rep_w, momentum, n_iter):
    has_p = np_valid > 0
    has_n = nn_valid > 0
    u_off = np_pad                 # stacked-row offset of the unlabeled block
    n_off = np_pad + nu_pad        # stacked-row offset of the negative block

    def kernel(feats_ref, rhs_ref, loss_ref, *neg_out):
        feats = feats_ref[...].astype(jnp.float32)           # (Ns, D) raw stack
        feats_n = _row_normalize(feats)                       # each feature ONCE
        # columns: [pos | neg_old | proxy]; col-normalize handles un-normalized
        # proxy_u and is a no-op on the already-unit pos / neg_old columns.
        rhs = _col_normalize(rhs_ref[...].astype(jnp.float32))    # (D, 1+K+P)
        pos_t = rhs[:, 0:1]
        neg_old_t = rhs[:, 1:1 + K]

        # ---- one MXU contraction against all fixed columns ----
        big = jnp.dot(feats_n, rhs, preferred_element_type=jnp.float32)  # (Ns,1+K+P)

        # ---- positive alignment loss ----
        if has_p:
            sim_p = big[0:np_pad, 0:1]            # zero-padded rows contribute 0
            l_loss = 1.0 - jnp.sum(sim_p) * (1.0 / np_valid)
        else:
            l_loss = jnp.float32(0.0)

        # ---- negative-center EMA update (uses the OLD centers) ----
        if has_n:
            sim_pos_n = big[n_off:n_off + nn_pad, 0:1]         # (Nn, 1)
            sim_neg_n = big[n_off:n_off + nn_pad, 1:1 + K]     # (Nn, K)
            keep = (sim_pos_n < 0.7).astype(jnp.float32)
            if nn_valid < nn_pad:
                rid = jax.lax.broadcasted_iota(jnp.int32, (nn_pad, 1), 0)
                keep = keep * (rid < nn_valid).astype(jnp.float32)
            # first-argmax one-hot (matches torch argmax tie-breaking)
            row_max = jnp.max(sim_neg_n, axis=1, keepdims=True)
            col = jax.lax.broadcasted_iota(jnp.int32, (nn_pad, K), 1).astype(jnp.float32)
            cand = jnp.where(sim_neg_n >= row_max, col, float(K))
            first = jnp.min(cand, axis=1, keepdims=True)
            member = jnp.where(col == first, 1.0, 0.0) * keep              # (Nn, K)
            counts = jnp.sum(member, axis=0, keepdims=True)                # (1, K)
            keep_count = jnp.sum(keep)
            n_raw = feats[n_off:n_off + nn_pad, :]                         # (Nn, D)
            # per-cluster feature sums via one small matmul (no K-way loop)
            sums_t = jax.lax.dot_general(n_raw, member, (((0,), (0,)), ((), ())),
                                         preferred_element_type=jnp.float32)  # (D, K)
            new_t = _col_normalize(sums_t)      # normalize(sum) == normalize(mean)
            lerped = neg_old_t + (1.0 - momentum) * (new_t - neg_old_t)    # lerp_
            lerped = _col_normalize(lerped)                                # renorm
            do_update = jnp.logical_and(counts >= 3.0, keep_count > 0.0)   # (1, K)
            neg_t = jnp.where(do_update, lerped, neg_old_t)                # (D, K)
        else:
            neg_t = neg_old_t

        # padded-row mask for the unlabeled block (compiled out when unneeded)
        if nu_valid < nu_pad:
            u_rid = jax.lax.broadcasted_iota(jnp.int32, (nu_pad, 1), 0)
            u_mask = (u_rid < nu_valid).astype(jnp.float32)
        else:
            u_mask = None

        # ---- [u; n] rows vs UPDATED centers: one contiguous matmul ----
        if has_n:
            un_n = feats_n[u_off:n_off + nn_pad, :]            # (Nu+Nn, D)
            sim_un = jnp.dot(un_n, neg_t, preferred_element_type=jnp.float32)
            sim_u_neg = sim_un[0:nu_pad, :]
            sim_n = sim_un[nu_pad:nu_pad + nn_pad, :]
            # negative self-distillation loss
            m = jnp.max(sim_n, axis=1, keepdims=True)
            e = jnp.exp(sim_n - m)
            s = jnp.sum(e, axis=1, keepdims=True)
            logp_n = (sim_n - m) - jnp.log(s)
            row_ce = jnp.sum((e / s) * logp_n, axis=1, keepdims=True)      # (Nn, 1)
            if nn_valid < nn_pad:
                rid = jax.lax.broadcasted_iota(jnp.int32, (nn_pad, 1), 0)
                row_ce = row_ce * (rid < nn_valid).astype(jnp.float32)
            loss_n = -jnp.sum(row_ce) * (1.0 / nn_valid)
        else:
            # centers unchanged -> fixed-column sims from `big` are already correct
            sim_u_neg = big[u_off:u_off + nu_pad, 1:1 + K]

        # ---- pseudo loss (unlabeled vs negative centers, sinkhorn target) ----
        tgt_pseudo = _sinkhorn_target(sim_u_neg, alpha, n_iter, u_mask)  # detached
        loss_pseudo = -jnp.sum(tgt_pseudo * _log_softmax_rows(sim_u_neg)) \
            * (1.0 / nu_valid)
        n_loss = 0.5 * (loss_n + loss_pseudo) if has_n else loss_pseudo

        # ---- unlabeled proxy loss ----
        u_sim = big[u_off:u_off + nu_pad, 1 + K:1 + K + P]                 # (Nu, P)
        u_tgt = _sinkhorn_target(u_sim, alpha, n_iter, u_mask)           # detached
        u_loss = -jnp.sum(u_tgt * _log_softmax_rows(u_sim * temp)) * (1.0 / nu_valid)

        # ---- repulsion loss ----
        eps = 1e-6
        sim_np = jnp.sum(neg_t * pos_t, axis=0, keepdims=True)             # (1, K)
        rep_np = -jnp.sum(jnp.log(jnp.maximum(1.0 - sim_np, eps))) * (1.0 / K)
        if K > 1:
            sim_nn = jax.lax.dot_general(neg_t, neg_t, (((0,), (0,)), ((), ())),
                                         preferred_element_type=jnp.float32)  # (K,K)
            ri = jax.lax.broadcasted_iota(jnp.int32, (K, K), 0)
            ci = jax.lax.broadcasted_iota(jnp.int32, (K, K), 1)
            offd = (ri != ci).astype(jnp.float32)
            rep_nn = jnp.sum(offd * (-jnp.log(jnp.maximum(1.0 - sim_nn, eps)))) \
                * (1.0 / (K * (K - 1)))
        else:
            rep_nn = jnp.float32(0.0)   # guard K == 1 (avoid div-by-zero)
        rep_loss = rep_np + 0.1 * rep_nn

        cls_loss = (tau * l_loss + lambda_n * n_loss
                    + (0.55 - tau) * u_loss + rep_w * rep_loss)

        # all five scalars -> one SMEM output (no padded (8,128) VMEM tile)
        loss_ref[0] = cls_loss
        loss_ref[1] = l_loss
        loss_ref[2] = n_loss
        loss_ref[3] = u_loss
        loss_ref[4] = rep_loss
        if has_n:
            # (D, K) column layout (512 B); wrapper transposes to (K, D) when
            # persisting.  # TODO(synk): at larger K emit (K, D) directly for
            # lane-dense stores / alias the input buffer in place.
            neg_out[0][...] = neg_t

    return kernel


# ------------------------------ Pallas wrapper -------------------------------

def _pad_rows(x, multiple=8):
    rows = x.shape[0]
    pad = (-rows) % multiple
    if pad:
        x = jnp.concatenate([x, jnp.zeros((pad,) + x.shape[1:], x.dtype)], axis=0)
    return x, rows, rows + pad


def proxy_forward(params, p_feats, u_feats, n_feats=None, *,
                  alpha=20.0, temp=10.0, tau=0.45, lambda_n=0.3,
                  repulsion_weight=0.15, momentum=0.9, n_iter=3):
    """Returns (cls_loss, regularizer, updated_negative_centers).

    The PyTorch module mutates its `negative_centers` buffer in place; here the
    updated centers are returned so the caller can thread the state.
    """
    pos = params["positive_center"]       # (1, D), unit rows
    neg = params["negative_centers"]      # (K, D), unit rows
    pxu = params["proxy_u"]               # (P, D), un-normalized
    K, D = neg.shape
    P = pxu.shape[0]

    has_p = p_feats is not None and p_feats.shape[0] > 0
    has_n = n_feats is not None and n_feats.shape[0] > 0

    # Stack [p; u; n] raw features; each block zero-padded to a multiple of 8
    # rows so every in-kernel row slice is sublane-aligned.  Feature dtype is
    # preserved on the wire (bf16 stays bf16); the kernel upcasts to f32.
    blocks = []
    np_v = np_p = 0
    if has_p:
        pb, np_v, np_p = _pad_rows(p_feats)
        blocks.append(pb)
    ub, nu_v, nu_p = _pad_rows(u_feats)
    blocks.append(ub)
    nn_v = nn_p = 0
    if has_n:
        nb, nn_v, nn_p = _pad_rows(n_feats)
        blocks.append(nb)
    feats = blocks[0] if len(blocks) == 1 else jnp.concatenate(blocks, axis=0)

    # All "fixed" RHS columns in one pre-transposed (D, 1+K+P) operand so every
    # in-kernel cosine matmul is the natural (M, D) x (D, N) MXU contraction.
    rhs_all = jnp.concatenate([pos, neg, pxu], axis=0).T

    kernel = _make_fused_kernel(np_v, np_p, nu_v, nu_p, nn_v, nn_p, K, P,
                                float(alpha), float(temp), float(tau),
                                float(lambda_n), float(repulsion_weight),
                                float(momentum), int(n_iter))

    if has_n:
        out_shape = (jax.ShapeDtypeStruct((5,), jnp.float32),
                     jax.ShapeDtypeStruct((D, K), jnp.float32))
        out_specs = (_SMEM, _VMEM)
    else:
        out_shape = jax.ShapeDtypeStruct((5,), jnp.float32)
        out_specs = _SMEM

    outs = pl.pallas_call(
        kernel,
        out_shape=out_shape,
        in_specs=[_VMEM, _VMEM],
        out_specs=out_specs,
    )(feats, rhs_all)

    if has_n:
        losses, neg_new_t = outs
        new_neg = neg_new_t.T.astype(neg.dtype)   # (K, D) row layout for the buffer
    else:
        losses = outs
        new_neg = neg

    cls_loss = losses[0]
    regularizer = {"l": losses[1], "u": losses[3], "n": losses[2], "rep": losses[4]}
    return cls_loss, regularizer, new_neg


# -------------------------- params & pure-JAX reference ----------------------

def _l2n(x, axis=1):
    return x / jnp.maximum(jnp.sqrt(jnp.sum(x * x, axis=axis, keepdims=True)), 1e-12)


def init_proxy_params(key, num_proxies, dim, num_centers_n=4):
    k1, k2, k3 = jax.random.split(key, 3)
    return {
        "positive_center": _l2n(jax.random.normal(k1, (1, dim), jnp.float32)),
        "proxy_u": jax.random.normal(k2, (num_proxies, dim), jnp.float32),
        "negative_centers": _l2n(jax.random.normal(k3, (num_centers_n, dim),
                                                   jnp.float32)),
    }


def _reference_forward(params, p_feats, u_feats, n_feats, *, alpha=20.0, temp=10.0,
                       tau=0.45, lambda_n=0.3, repulsion_weight=0.15,
                       momentum=0.9, n_iter=3):
    """Straight jnp transcription of the PyTorch module (correctness oracle)."""
    def cos(a, b):
        return _l2n(a) @ _l2n(b).T

    def sinkhorn(sim, a, it):          # full (un-pruned) reference sinkhorn
        Q = jnp.exp(a * sim).T
        Kd, Bd = Q.shape
        Q = Q / jnp.sum(Q)
        for _ in range(it):
            Q = Q / jnp.sum(Q, axis=1, keepdims=True); Q = Q / Kd
            Q = Q / jnp.sum(Q, axis=0, keepdims=True); Q = Q / Bd
        return (Q * Bd).T

    def log_softmax(x):
        m = jnp.max(x, axis=1, keepdims=True)
        return (x - m) - jnp.log(jnp.sum(jnp.exp(x - m), axis=1, keepdims=True))

    pos, neg, pxu = (params["positive_center"], params["negative_centers"],
                     params["proxy_u"])

    keep = cos(n_feats, pos)[:, 0] < 0.7
    assign = jnp.argmax(cos(n_feats, neg), axis=1)
    rows = []
    for i in range(neg.shape[0]):
        m = keep & (assign == i)
        cnt = jnp.sum(m)
        mean = jnp.sum(n_feats * m[:, None], axis=0) / jnp.maximum(cnt, 1)
        newc = _l2n(mean[None, :])[0]
        lerped = neg[i] + (1.0 - momentum) * (newc - neg[i])
        lerped = lerped / jnp.maximum(jnp.sqrt(jnp.sum(lerped * lerped)), 1e-12)
        rows.append(jnp.where((jnp.sum(keep) > 0) & (cnt >= 3), lerped, neg[i]))
    neg = jnp.stack(rows)

    l_loss = jnp.mean(1.0 - cos(pos, p_feats))
    sim_n = cos(n_feats, neg)
    loss_n = -jnp.mean(jnp.sum(jax.nn.softmax(sim_n, axis=1) * log_softmax(sim_n),
                               axis=1))
    sim_u_neg = cos(u_feats, neg)
    loss_pseudo = -jnp.mean(jnp.sum(sinkhorn(sim_u_neg, alpha, n_iter)
                                    * log_softmax(sim_u_neg), axis=1))
    n_loss = 0.5 * (loss_n + loss_pseudo)
    u_sim = cos(u_feats, pxu)
    u_loss = -jnp.mean(jnp.sum(sinkhorn(u_sim, alpha, n_iter)
                               * log_softmax(u_sim * temp), axis=1))
    eps = 1e-6
    rep_np = jnp.mean(-jnp.log(jnp.maximum(1.0 - cos(neg, pos)[:, 0], eps)))
    K = neg.shape[0]
    sim_nn = cos(neg, neg)
    offd = ~jnp.eye(K, dtype=bool)
    rep_nn = jnp.sum(jnp.where(offd, -jnp.log(jnp.maximum(1.0 - sim_nn, eps)), 0.0)) \
        / (K * (K - 1))
    rep = rep_np + 0.1 * rep_nn
    cls = tau * l_loss + lambda_n * n_loss + (0.55 - tau) * u_loss \
        + repulsion_weight * rep
    return cls, {"l": l_loss, "u": u_loss, "n": n_loss, "rep": rep}, neg


# ------------------------------------ main -----------------------------------

if __name__ == "__main__":
    num_proxies, dim, num_centers_n = 8, 32, 4

    key = jax.random.PRNGKey(0)
    k_params, k_p, k_u, k_n = jax.random.split(key, 4)

    params = init_proxy_params(k_params, num_proxies, dim, num_centers_n)
    p_feats = jax.random.normal(k_p, (6, dim), jnp.float32)   # exercises pad-to-8
    u_feats = jax.random.normal(k_u, (16, dim), jnp.float32)
    n_feats = jax.random.normal(k_n, (8, dim), jnp.float32)

    fwd = jax.jit(proxy_forward)
    cls_loss, regularizer, new_neg = fwd(params, p_feats, u_feats, n_feats)
    jax.block_until_ready((cls_loss, regularizer, new_neg))

    ref_cls, ref_reg, ref_neg = jax.jit(_reference_forward)(
        params, p_feats, u_feats, n_feats)
    np.testing.assert_allclose(np.asarray(cls_loss), np.asarray(ref_cls),
                               rtol=5e-3, atol=5e-4)
    for name in ("l", "u", "n", "rep"):
        np.testing.assert_allclose(np.asarray(regularizer[name]),
                                   np.asarray(ref_reg[name]), rtol=5e-3, atol=5e-4)
    np.testing.assert_allclose(np.asarray(new_neg), np.asarray(ref_neg),
                               rtol=5e-3, atol=5e-4)

    print("KERNEL_OK")
</pallas_src>

<mosaic_0001>
module attributes {stable_mosaic.version = 11 : i64} {
  func.func @kernel(%arg0: memref<32x32xf32, #tpu.memory_space<vmem>>, %arg1: memref<32x13xf32, #tpu.memory_space<vmem>>, %arg2: memref<5xf32, #tpu.memory_space<smem>>, %arg3: memref<32x4xf32, #tpu.memory_space<vmem>>) attributes {dimension_semantics = [], scalar_prefetch = 0 : i64, scratch_operands = 0 : i64, tpu.core_type = #tpu.core_type<tc>} {
    %c0 = arith.constant 0 : index
    %c0_0 = arith.constant 0 : index
    %0 = vector.load %arg0[%c0, %c0_0] : memref<32x32xf32, #tpu.memory_space<vmem>>, vector<32x32xf32>
    %1 = arith.mulf %0, %0 : vector<32x32xf32>
    %cst = arith.constant dense<0.000000e+00> : vector<32xf32>
    %2 = vector.multi_reduction <add>, %1, %cst [1] : vector<32x32xf32> to vector<32xf32>
    %3 = vector.shape_cast %2 : vector<32xf32> to vector<32x1xf32>
    %cst_1 = arith.constant 1.000000e-24 : f32
    %4 = vector.broadcast %cst_1 : f32 to vector<32x1xf32>
    %5 = arith.maximumf %3, %4 : vector<32x1xf32>
    %6 = math.rsqrt %5 : vector<32x1xf32>
    %7 = vector.broadcast %6 : vector<32x1xf32> to vector<32x32xf32>
    %8 = arith.mulf %0, %7 : vector<32x32xf32>
    %c0_2 = arith.constant 0 : index
    %c0_3 = arith.constant 0 : index
    %9 = vector.load %arg1[%c0_2, %c0_3] : memref<32x13xf32, #tpu.memory_space<vmem>>, vector<32x13xf32>
    %10 = arith.mulf %9, %9 : vector<32x13xf32>
    %cst_4 = arith.constant dense<0.000000e+00> : vector<13xf32>
    %11 = vector.multi_reduction <add>, %10, %cst_4 [0] : vector<32x13xf32> to vector<13xf32>
    %12 = vector.shape_cast %11 : vector<13xf32> to vector<1x13xf32>
    %cst_5 = arith.constant 1.000000e-24 : f32
    %13 = vector.broadcast %cst_5 : f32 to vector<1x13xf32>
    %14 = arith.maximumf %12, %13 : vector<1x13xf32>
    %15 = math.rsqrt %14 : vector<1x13xf32>
    %16 = vector.broadcast %15 : vector<1x13xf32> to vector<32x13xf32>
    %17 = arith.mulf %9, %16 : vector<32x13xf32>
    %18 = vector.extract_strided_slice %17 {offsets = [0, 0], sizes = [32, 1], strides = [1, 1]} : vector<32x13xf32> to vector<32x1xf32>
    %19 = vector.extract_strided_slice %17 {offsets = [0, 1], sizes = [32, 4], strides = [1, 1]} : vector<32x13xf32> to vector<32x4xf32>
    %cst_6 = arith.constant dense<0.000000e+00> : vector<32x13xf32>
    %20 = tpu.matmul %8, %17, %cst_6 {dimension_numbers = #tpu.dot_dimension_numbers<[1], [0], [0], [1], [0, 0, 1, 1], [], []>} : vector<32x32xf32>, vector<32x13xf32>, vector<32x13xf32> -> vector<32x13xf32>
    %21 = vector.extract_strided_slice %20 {offsets = [0, 0], sizes = [8, 1], strides = [1, 1]} : vector<32x13xf32> to vector<8x1xf32>
    %22 = vector.shape_cast %21 : vector<8x1xf32> to vector<1x8x1xf32>
    %cst_7 = arith.constant dense<0.000000e+00> : vector<1xf32>
    %23 = vector.multi_reduction <add>, %22, %cst_7 [1, 2] : vector<1x8x1xf32> to vector<1xf32>
    %24 = vector.shape_cast %23 : vector<1xf32> to vector<1x1x1xf32>
    %25 = vector.extract %24[0, 0, 0] : f32 from vector<1x1x1xf32>
    %cst_8 = arith.constant 0.166666672 : f32
    %26 = arith.mulf %25, %cst_8 : f32
    %cst_9 = arith.constant 1.000000e+00 : f32
    %27 = arith.subf %cst_9, %26 : f32
    %28 = vector.extract_strided_slice %20 {offsets = [24, 0], sizes = [8, 1], strides = [1, 1]} : vector<32x13xf32> to vector<8x1xf32>
    %29 = vector.extract_strided_slice %20 {offsets = [24, 1], sizes = [8, 4], strides = [1, 1]} : vector<32x13xf32> to vector<8x4xf32>
    %cst_10 = arith.constant 0.699999988 : f32
    %30 = vector.broadcast %cst_10 : f32 to vector<8x1xf32>
    %31 = arith.cmpf olt, %28, %30 : vector<8x1xf32>
    %32 = arith.extui %31 : vector<8x1xi1> to vector<8x1xi32>
    %33 = arith.sitofp %32 : vector<8x1xi32> to vector<8x1xf32>
    %cst_11 = arith.constant dense<0xFF800000> : vector<8xf32>
    %34 = vector.multi_reduction <maximumf>, %29, %cst_11 [1] : vector<8x4xf32> to vector<8xf32>
    %35 = vector.shape_cast %34 : vector<8xf32> to vector<8x1xf32>
    %36 = tpu.iota {dimensions = array<i32: 1>} : vector<8x4xi32>
    %37 = arith.sitofp %36 : vector<8x4xi32> to vector<8x4xf32>
    %38 = vector.broadcast %35 : vector<8x1xf32> to vector<8x4xf32>
    %39 = arith.cmpf oge, %29, %38 : vector<8x4xf32>
    %cst_12 = arith.constant 4.000000e+00 : f32
    %40 = vector.broadcast %cst_12 : f32 to vector<8x4xf32>
    %41 = arith.select %39, %37, %40 : vector<8x4xi1>, vector<8x4xf32>
    %cst_13 = arith.constant dense<0x7F800000> : vector<8xf32>
    %42 = vector.multi_reduction <minimumf>, %41, %cst_13 [1] : vector<8x4xf32> to vector<8xf32>
    %43 = vector.shape_cast %42 : vector<8xf32> to vector<8x1xf32>
    %44 = vector.broadcast %43 : vector<8x1xf32> to vector<8x4xf32>
    %45 = arith.cmpf oeq, %37, %44 : vector<8x4xf32>
    %cst_14 = arith.constant 1.000000e+00 : f32
    %cst_15 = arith.constant 0.000000e+00 : f32
    %46 = vector.broadcast %cst_14 : f32 to vector<8x4xf32>
    %47 = vector.broadcast %cst_15 : f32 to vector<8x4xf32>
    %48 = arith.select %45, %46, %47 : vector<8x4xi1>, vector<8x4xf32>
    %49 = vector.broadcast %33 : vector<8x1xf32> to vector<8x4xf32>
    %50 = arith.mulf %48, %49 : vector<8x4xf32>
    %cst_16 = arith.constant dense<0.000000e+00> : vector<4xf32>
    %51 = vector.multi_reduction <add>, %50, %cst_16 [0] : vector<8x4xf32> to vector<4xf32>
    %52 = vector.shape_cast %51 : vector<4xf32> to vector<1x4xf32>
    %53 = vector.shape_cast %33 : vector<8x1xf32> to vector<1x8x1xf32>
    %cst_17 = arith.constant dense<0.000000e+00> : vector<1xf32>
    %54 = vector.multi_reduction <add>, %53, %cst_17 [1, 2] : vector<1x8x1xf32> to vector<1xf32>
    %55 = vector.shape_cast %54 : vector<1xf32> to vector<1x1x1xf32>
    %56 = vector.extract %55[0, 0, 0] : f32 from vector<1x1x1xf32>
    %57 = vector.extract_strided_slice %0 {offsets = [24, 0], sizes = [8, 32], strides = [1, 1]} : vector<32x32xf32> to vector<8x32xf32>
    %cst_18 = arith.constant dense<0.000000e+00> : vector<32x4xf32>
    %58 = tpu.matmul %57, %50, %cst_18 {dimension_numbers = #tpu.dot_dimension_numbers<[0], [0], [1], [1], [0, 1, 1, 1], [], []>} : vector<8x32xf32>, vector<8x4xf32>, vector<32x4xf32> -> vector<32x4xf32>
    %59 = arith.mulf %58, %58 : vector<32x4xf32>
    %cst_19 = arith.constant dense<0.000000e+00> : vector<4xf32>
    %60 = vector.multi_reduction <add>, %59, %cst_19 [0] : vector<32x4xf32> to vector<4xf32>
    %61 = vector.shape_cast %60 : vector<4xf32> to vector<1x4xf32>
    %cst_20 = arith.constant 1.000000e-24 : f32
    %62 = vector.broadcast %cst_20 : f32 to vector<1x4xf32>
    %63 = arith.maximumf %61, %62 : vector<1x4xf32>
    %64 = math.rsqrt %63 : vector<1x4xf32>
    %65 = vector.broadcast %64 : vector<1x4xf32> to vector<32x4xf32>
    %66 = arith.mulf %58, %65 : vector<32x4xf32>
    %67 = arith.subf %66, %19 : vector<32x4xf32>
    %cst_21 = arith.constant 1.000000e-01 : f32
    %68 = vector.broadcast %cst_21 : f32 to vector<32x4xf32>
    %69 = arith.mulf %68, %67 : vector<32x4xf32>
    %70 = arith.addf %19, %69 : vector<32x4xf32>
    %71 = arith.mulf %70, %70 : vector<32x4xf32>
    %cst_22 = arith.constant dense<0.000000e+00> : vector<4xf32>
    %72 = vector.multi_reduction <add>, %71, %cst_22 [0] : vector<32x4xf32> to vector<4xf32>
    %73 = vector.shape_cast %72 : vector<4xf32> to vector<1x4xf32>
    %cst_23 = arith.constant 1.000000e-24 : f32
    %74 = vector.broadcast %cst_23 : f32 to vector<1x4xf32>
    %75 = arith.maximumf %73, %74 : vector<1x4xf32>
    %76 = math.rsqrt %75 : vector<1x4xf32>
    %77 = vector.broadcast %76 : vector<1x4xf32> to vector<32x4xf32>
    %78 = arith.mulf %70, %77 : vector<32x4xf32>
    %cst_24 = arith.constant 3.000000e+00 : f32
    %79 = vector.broadcast %cst_24 : f32 to vector<1x4xf32>
    %80 = arith.cmpf oge, %52, %79 : vector<1x4xf32>
    %cst_25 = arith.constant 0.000000e+00 : f32
    %81 = arith.cmpf ogt, %56, %cst_25 : f32
    %82 = vector.broadcast %81 : i1 to vector<1x4xi1>
    %83 = arith.andi %80, %82 : vector<1x4xi1>
    %84 = vector.shape_cast %83 : vector<1x4xi1> to vector<1x4xi1>
    %85 = vector.broadcast %84 : vector<1x4xi1> to vector<32x4xi1>
    %86 = arith.select %85, %78, %19 : vector<32x4xi1>, vector<32x4xf32>
    %87 = vector.extract_strided_slice %8 {offsets = [8, 0], sizes = [24, 32], strides = [1, 1]} : vector<32x32xf32> to vector<24x32xf32>
    %cst_26 = arith.constant dense<0.000000e+00> : vector<24x4xf32>
    %88 = tpu.matmul %87, %86, %cst_26 {dimension_numbers = #tpu.dot_dimension_numbers<[1], [0], [0], [1], [0, 0, 1, 1], [], []>} : vector<24x32xf32>, vector<32x4xf32>, vector<24x4xf32> -> vector<24x4xf32>
    %89 = vector.extract_strided_slice %88 {offsets = [0, 0], sizes = [16, 4], strides = [1, 1]} : vector<24x4xf32> to vector<16x4xf32>
    %90 = vector.extract_strided_slice %88 {offsets = [16, 0], sizes = [8, 4], strides = [1, 1]} : vector<24x4xf32> to vector<8x4xf32>
    %cst_27 = arith.constant dense<0xFF800000> : vector<8xf32>
    %91 = vector.multi_reduction <maximumf>, %90, %cst_27 [1] : vector<8x4xf32> to vector<8xf32>
    %92 = vector.shape_cast %91 : vector<8xf32> to vector<8x1xf32>
    %93 = vector.broadcast %92 : vector<8x1xf32> to vector<8x4xf32>
    %94 = arith.subf %90, %93 : vector<8x4xf32>
    %95 = math.exp %94 : vector<8x4xf32>
    %cst_28 = arith.constant dense<0.000000e+00> : vector<8xf32>
    %96 = vector.multi_reduction <add>, %95, %cst_28 [1] : vector<8x4xf32> to vector<8xf32>
    %97 = vector.shape_cast %96 : vector<8xf32> to vector<8x1xf32>
    %98 = vector.broadcast %92 : vector<8x1xf32> to vector<8x4xf32>
    %99 = arith.subf %90, %98 : vector<8x4xf32>
    %100 = math.log %97 : vector<8x1xf32>
    %101 = vector.broadcast %100 : vector<8x1xf32> to vector<8x4xf32>
    %102 = arith.subf %99, %101 : vector<8x4xf32>
    %103 = vector.broadcast %97 : vector<8x1xf32> to vector<8x4xf32>
    %104 = arith.divf %95, %103 : vector<8x4xf32>
    %105 = arith.mulf %104, %102 : vector<8x4xf32>
    %cst_29 = arith.constant dense<0.000000e+00> : vector<8xf32>
    %106 = vector.multi_reduction <add>, %105, %cst_29 [1] : vector<8x4xf32> to vector<8xf32>
    %107 = vector.shape_cast %106 : vector<8xf32> to vector<8x1xf32>
    %108 = vector.shape_cast %107 : vector<8x1xf32> to vector<1x8x1xf32>
    %cst_30 = arith.constant dense<0.000000e+00> : vector<1xf32>
    %109 = vector.multi_reduction <add>, %108, %cst_30 [1, 2] : vector<1x8x1xf32> to vector<1xf32>
    %110 = vector.shape_cast %109 : vector<1xf32> to vector<1x1x1xf32>
    %111 = vector.extract %110[0, 0, 0] : f32 from vector<1x1x1xf32>
    %cst_31 = arith.constant 0.000000e+00 : f32
    %112 = arith.subf %cst_31, %111 : f32
    %cst_32 = arith.constant 1.250000e-01 : f32
    %113 = arith.mulf %112, %cst_32 : f32
    %cst_33 = arith.constant 2.000000e+01 : f32
    %114 = vector.broadcast %cst_33 : f32 to vector<16x4xf32>
    %115 = arith.mulf %114, %89 : vector<16x4xf32>
    %116 = math.exp %115 : vector<16x4xf32>
    %cst_34 = arith.constant dense<0.000000e+00> : vector<4xf32>
    %117 = vector.multi_reduction <add>, %116, %cst_34 [0] : vector<16x4xf32> to vector<4xf32>
    %118 = vector.shape_cast %117 : vector<4xf32> to vector<1x4xf32>
    %119 = vector.broadcast %118 : vector<1x4xf32> to vector<16x4xf32>
    %120 = arith.divf %116, %119 : vector<16x4xf32>
    %cst_35 = arith.constant dense<0.000000e+00> : vector<16xf32>
    %121 = vector.multi_reduction <add>, %120, %cst_35 [1] : vector<16x4xf32> to vector<16xf32>
    %122 = vector.shape_cast %121 : vector<16xf32> to vector<16x1xf32>
    %123 = vector.broadcast %122 : vector<16x1xf32> to vector<16x4xf32>
    %124 = arith.divf %120, %123 : vector<16x4xf32>
    %cst_36 = arith.constant dense<0.000000e+00> : vector<4xf32>
    %125 = vector.multi_reduction <add>, %124, %cst_36 [0] : vector<16x4xf32> to vector<4xf32>
    %126 = vector.shape_cast %125 : vector<4xf32> to vector<1x4xf32>
    %127 = vector.broadcast %126 : vector<1x4xf32> to vector<16x4xf32>
    %128 = arith.divf %124, %127 : vector<16x4xf32>
    %cst_37 = arith.constant dense<0.000000e+00> : vector<16xf32>
    %129 = vector.multi_reduction <add>, %128, %cst_37 [1] : vector<16x4xf32> to vector<16xf32>
    %130 = vector.shape_cast %129 : vector<16xf32> to vector<16x1xf32>
    %131 = vector.broadcast %130 : vector<16x1xf32> to vector<16x4xf32>
    %132 = arith.divf %128, %131 : vector<16x4xf32>
    %cst_38 = arith.constant dense<0.000000e+00> : vector<4xf32>
    %133 = vector.multi_reduction <add>, %132, %cst_38 [0] : vector<16x4xf32> to vector<4xf32>
    %134 = vector.shape_cast %133 : vector<4xf32> to vector<1x4xf32>
    %135 = vector.broadcast %134 : vector<1x4xf32> to vector<16x4xf32>
    %136 = arith.divf %132, %135 : vector<16x4xf32>
    %cst_39 = arith.constant dense<0.000000e+00> : vector<16xf32>
    %137 = vector.multi_reduction <add>, %136, %cst_39 [1] : vector<16x4xf32> to vector<16xf32>
    %138 = vector.shape_cast %137 : vector<16xf32> to vector<16x1xf32>
    %139 = vector.broadcast %138 : vector<16x1xf32> to vector<16x4xf32>
    %140 = arith.divf %136, %139 : vector<16x4xf32>
    %cst_40 = arith.constant dense<0xFF800000> : vector<16xf32>
    %141 = vector.multi_reduction <maximumf>, %89, %cst_40 [1] : vector<16x4xf32> to vector<16xf32>
    %142 = vector.shape_cast %141 : vector<16xf32> to vector<16x1xf32>
    %143 = vector.broadcast %142 : vector<16x1xf32> to vector<16x4xf32>
    %144 = arith.subf %89, %143 : vector<16x4xf32>
    %145 = math.exp %144 : vector<16x4xf32>
    %cst_41 = arith.constant dense<0.000000e+00> : vector<16xf32>
    %146 = vector.multi_reduction <add>, %145, %cst_41 [1] : vector<16x4xf32> to vector<16xf32>
    %147 = vector.shape_cast %146 : vector<16xf32> to vector<16x1xf32>
    %148 = math.log %147 : vector<16x1xf32>
    %149 = vector.broadcast %148 : vector<16x1xf32> to vector<16x4xf32>
    %150 = arith.subf %144, %149 : vector<16x4xf32>
    %151 = arith.mulf %140, %150 : vector<16x4xf32>
    %152 = vector.shape_cast %151 : vector<16x4xf32> to vector<1x16x4xf32>
    %cst_42 = arith.constant dense<0.000000e+00> : vector<1xf32>
    %153 = vector.multi_reduction <add>, %152, %cst_42 [1, 2] : vector<1x16x4xf32> to vector<1xf32>
    %154 = vector.shape_cast %153 : vector<1xf32> to vector<1x1x1xf32>
    %155 = vector.extract %154[0, 0, 0] : f32 from vector<1x1x1xf32>
    %cst_43 = arith.constant 0.000000e+00 : f32
    %156 = arith.subf %cst_43, %155 : f32
    %cst_44 = arith.constant 6.250000e-02 : f32
    %157 = arith.mulf %156, %cst_44 : f32
    %158 = arith.addf %113, %157 : f32
    %cst_45 = arith.constant 5.000000e-01 : f32
    %159 = arith.mulf %cst_45, %158 : f32
    %160 = vector.extract_strided_slice %20 {offsets = [8, 5], sizes = [16, 8], strides = [1, 1]} : vector<32x13xf32> to vector<16x8xf32>
    %cst_46 = arith.constant 2.000000e+01 : f32
    %161 = vector.broadcast %cst_46 : f32 to vector<16x8xf32>
    %162 = arith.mulf %161, %160 : vector<16x8xf32>
    %163 = math.exp %162 : vector<16x8xf32>
    %cst_47 = arith.constant dense<0.000000e+00> : vector<8xf32>
    %164 = vector.multi_reduction <add>, %163, %cst_47 [0] : vector<16x8xf32> to vector<8xf32>
    %165 = vector.shape_cast %164 : vector<8xf32> to vector<1x8xf32>
    %166 = vector.broadcast %165 : vector<1x8xf32> to vector<16x8xf32>
    %167 = arith.divf %163, %166 : vector<16x8xf32>
    %cst_48 = arith.constant dense<0.000000e+00> : vector<16xf32>
    %168 = vector.multi_reduction <add>, %167, %cst_48 [1] : vector<16x8xf32> to vector<16xf32>
    %169 = vector.shape_cast %168 : vector<16xf32> to vector<16x1xf32>
    %170 = vector.broadcast %169 : vector<16x1xf32> to vector<16x8xf32>
    %171 = arith.divf %167, %170 : vector<16x8xf32>
    %cst_49 = arith.constant dense<0.000000e+00> : vector<8xf32>
    %172 = vector.multi_reduction <add>, %171, %cst_49 [0] : vector<16x8xf32> to vector<8xf32>
    %173 = vector.shape_cast %172 : vector<8xf32> to vector<1x8xf32>
    %174 = vector.broadcast %173 : vector<1x8xf32> to vector<16x8xf32>
    %175 = arith.divf %171, %174 : vector<16x8xf32>
    %cst_50 = arith.constant dense<0.000000e+00> : vector<16xf32>
    %176 = vector.multi_reduction <add>, %175, %cst_50 [1] : vector<16x8xf32> to vector<16xf32>
    %177 = vector.shape_cast %176 : vector<16xf32> to vector<16x1xf32>
    %178 = vector.broadcast %177 : vector<16x1xf32> to vector<16x8xf32>
    %179 = arith.divf %175, %178 : vector<16x8xf32>
    %cst_51 = arith.constant dense<0.000000e+00> : vector<8xf32>
    %180 = vector.multi_reduction <add>, %179, %cst_51 [0] : vector<16x8xf32> to vector<8xf32>
    %181 = vector.shape_cast %180 : vector<8xf32> to vector<1x8xf32>
    %182 = vector.broadcast %181 : vector<1x8xf32> to vector<16x8xf32>
    %183 = arith.divf %179, %182 : vector<16x8xf32>
    %cst_52 = arith.constant dense<0.000000e+00> : vector<16xf32>
    %184 = vector.multi_reduction <add>, %183, %cst_52 [1] : vector<16x8xf32> to vector<16xf32>
    %185 = vector.shape_cast %184 : vector<16xf32> to vector<16x1xf32>
    %186 = vector.broadcast %185 : vector<16x1xf32> to vector<16x8xf32>
    %187 = arith.divf %183, %186 : vector<16x8xf32>
    %cst_53 = arith.constant 1.000000e+01 : f32
    %188 = vector.broadcast %cst_53 : f32 to vector<16x8xf32>
    %189 = arith.mulf %160, %188 : vector<16x8xf32>
    %cst_54 = arith.constant dense<0xFF800000> : vector<16xf32>
    %190 = vector.multi_reduction <maximumf>, %189, %cst_54 [1] : vector<16x8xf32> to vector<16xf32>
    %191 = vector.shape_cast %190 : vector<16xf32> to vector<16x1xf32>
    %192 = vector.broadcast %191 : vector<16x1xf32> to vector<16x8xf32>
    %193 = arith.subf %189, %192 : vector<16x8xf32>
    %194 = math.exp %193 : vector<16x8xf32>
    %cst_55 = arith.constant dense<0.000000e+00> : vector<16xf32>
    %195 = vector.multi_reduction <add>, %194, %cst_55 [1] : vector<16x8xf32> to vector<16xf32>
    %196 = vector.shape_cast %195 : vector<16xf32> to vector<16x1xf32>
    %197 = math.log %196 : vector<16x1xf32>
    %198 = vector.broadcast %197 : vector<16x1xf32> to vector<16x8xf32>
    %199 = arith.subf %193, %198 : vector<16x8xf32>
    %200 = arith.mulf %187, %199 : vector<16x8xf32>
    %201 = vector.shape_cast %200 : vector<16x8xf32> to vector<1x16x8xf32>
    %cst_56 = arith.constant dense<0.000000e+00> : vector<1xf32>
    %202 = vector.multi_reduction <add>, %201, %cst_56 [1, 2] : vector<1x16x8xf32> to vector<1xf32>
    %203 = vector.shape_cast %202 : vector<1xf32> to vector<1x1x1xf32>
    %204 = vector.extract %203[0, 0, 0] : f32 from vector<1x1x1xf32>
    %cst_57 = arith.constant 0.000000e+00 : f32
    %205 = arith.subf %cst_57, %204 : f32
    %cst_58 = arith.constant 6.250000e-02 : f32
    %206 = arith.mulf %205, %cst_58 : f32
    %207 = vector.broadcast %18 : vector<32x1xf32> to vector<32x4xf32>
    %208 = arith.mulf %86, %207 : vector<32x4xf32>
    %cst_59 = arith.constant dense<0.000000e+00> : vector<4xf32>
    %209 = vector.multi_reduction <add>, %208, %cst_59 [0] : vector<32x4xf32> to vector<4xf32>
    %210 = vector.shape_cast %209 : vector<4xf32> to vector<1x4xf32>
    %cst_60 = arith.constant 1.000000e+00 : f32
    %211 = vector.broadcast %cst_60 : f32 to vector<1x4xf32>
    %212 = arith.subf %211, %210 : vector<1x4xf32>
    %cst_61 = arith.constant 9.99999997E-7 : f32
    %213 = vector.broadcast %cst_61 : f32 to vector<1x4xf32>
    %214 = arith.maximumf %212, %213 : vector<1x4xf32>
    %215 = math.log %214 : vector<1x4xf32>
    %216 = vector.shape_cast %215 : vector<1x4xf32> to vector<1x1x4xf32>
    %cst_62 = arith.constant dense<0.000000e+00> : vector<1xf32>
    %217 = vector.multi_reduction <add>, %216, %cst_62 [1, 2] : vector<1x1x4xf32> to vector<1xf32>
    %218 = vector.shape_cast %217 : vector<1xf32> to vector<1x1x1xf32>
    %219 = vector.extract %218[0, 0, 0] : f32 from vector<1x1x1xf32>
    %cst_63 = arith.constant 0.000000e+00 : f32
    %220 = arith.subf %cst_63, %219 : f32
    %cst_64 = arith.constant 2.500000e-01 : f32
    %221 = arith.mulf %220, %cst_64 : f32
    %cst_65 = arith.constant dense<0.000000e+00> : vector<4x4xf32>
    %222 = tpu.matmul %86, %86, %cst_65 {dimension_numbers = #tpu.dot_dimension_numbers<[0], [0], [1], [1], [0, 1, 1, 1], [], []>} : vector<32x4xf32>, vector<32x4xf32>, vector<4x4xf32> -> vector<4x4xf32>
    %223 = tpu.iota {dimensions = array<i32: 0>} : vector<4x4xi32>
    %224 = tpu.iota {dimensions = array<i32: 1>} : vector<4x4xi32>
    %225 = arith.cmpi ne, %223, %224 : vector<4x4xi32>
    %226 = arith.extui %225 : vector<4x4xi1> to vector<4x4xi32>
    %227 = arith.sitofp %226 : vector<4x4xi32> to vector<4x4xf32>
    %cst_66 = arith.constant 1.000000e+00 : f32
    %228 = vector.broadcast %cst_66 : f32 to vector<4x4xf32>
    %229 = arith.subf %228, %222 : vector<4x4xf32>
    %cst_67 = arith.constant 9.99999997E-7 : f32
    %230 = vector.broadcast %cst_67 : f32 to vector<4x4xf32>
    %231 = arith.maximumf %229, %230 : vector<4x4xf32>
    %232 = math.log %231 : vector<4x4xf32>
    %cst_68 = arith.constant 0.000000e+00 : f32
    %233 = vector.broadcast %cst_68 : f32 to vector<4x4xf32>
    %234 = arith.subf %233, %232 : vector<4x4xf32>
    %235 = arith.mulf %227, %234 : vector<4x4xf32>
    %236 = vector.shape_cast %235 : vector<4x4xf32> to vector<1x4x4xf32>
    %cst_69 = arith.constant dense<0.000000e+00> : vector<1xf32>
    %237 = vector.multi_reduction <add>, %236, %cst_69 [1, 2] : vector<1x4x4xf32> to vector<1xf32>
    %238 = vector.shape_cast %237 : vector<1xf32> to vector<1x1x1xf32>
    %239 = vector.extract %238[0, 0, 0] : f32 from vector<1x1x1xf32>
    %cst_70 = arith.constant 0.0833333358 : f32
    %240 = arith.mulf %239, %cst_70 : f32
    %cst_71 = arith.constant 1.000000e-01 : f32
    %241 = arith.mulf %cst_71, %240 : f32
    %242 = arith.addf %221, %241 : f32
    %cst_72 = arith.constant 4.500000e-01 : f32
    %243 = arith.mulf %cst_72, %27 : f32
    %cst_73 = arith.constant 3.000000e-01 : f32
    %244 = arith.mulf %cst_73, %159 : f32
    %245 = arith.addf %243, %244 : f32
    %cst_74 = arith.constant 1.000000e-01 : f32
    %246 = arith.mulf %cst_74, %206 : f32
    %247 = arith.addf %245, %246 : f32
    %cst_75 = arith.constant 1.500000e-01 : f32
    %248 = arith.mulf %cst_75, %242 : f32
    %249 = arith.addf %247, %248 : f32
    %c0_76 = arith.constant 0 : index
    %250 = memref.load %arg2[%c0_76] : memref<5xf32, #tpu.memory_space<smem>>
    memref.store %249, %arg2[%c0_76] : memref<5xf32, #tpu.memory_space<smem>>
    %c1 = arith.constant 1 : index
    %251 = memref.load %arg2[%c1] : memref<5xf32, #tpu.memory_space<smem>>
    memref.store %27, %arg2[%c1] : memref<5xf32, #tpu.memory_space<smem>>
    %c2 = arith.constant 2 : index
    %252 = memref.load %arg2[%c2] : memref<5xf32, #tpu.memory_space<smem>>
    memref.store %159, %arg2[%c2] : memref<5xf32, #tpu.memory_space<smem>>
    %c3 = arith.constant 3 : index
    %253 = memref.load %arg2[%c3] : memref<5xf32, #tpu.memory_space<smem>>
    memref.store %206, %arg2[%c3] : memref<5xf32, #tpu.memory_space<smem>>
    %c4 = arith.constant 4 : index
    %254 = memref.load %arg2[%c4] : memref<5xf32, #tpu.memory_space<smem>>
    memref.store %242, %arg2[%c4] : memref<5xf32, #tpu.memory_space<smem>>
    %c0_77 = arith.constant 0 : index
    %c0_78 = arith.constant 0 : index
    %255 = vector.load %arg3[%c0_77, %c0_78] : memref<32x4xf32, #tpu.memory_space<vmem>>, vector<32x4xf32>
    tpu.vector_store %arg3[%c0_77, %c0_78], %86 {strides = array<i32>} : memref<32x4xf32, #tpu.memory_space<vmem>>, vector<32x4xf32>,
    return
  }
}

</mosaic_0001>

<bundles_post_ra>
// kernel: proxy_forward.1
= control target key start
LH: loop header
LB: loop body
LE: loop exit
PB: predicated region body
PF: predicated region fallthrough
CT: control target
= control target key end

     0   :  { %vm22_vm0 = vcmask 261120   ;;  %vm55_vm1 = vcmask 105472   ;;  %s1694_s0 = inlined_call_operand.vmem [shape: f32[32,32], index: 0, kind: input, shape index: {}]   ;;  %s1695_s1 = inlined_call_operand.vmem [shape: f32[32,13], index: 1, kind: input, shape index: {}]   ;;  %s1696_s2 = inlined_call_operand.vmem [shape: f32[5], index: 2, kind: output, shape index: {0}]   ;;  %s1697_s3 = inlined_call_operand.vmem [shape: f32[32,4], index: 3, kind: output, shape index: {1}]  }
   0x1   :  { %v1317_v0 = vld [vmem:[%s1694_s0] sm:$0xff]  ;;  %v1322_v1 = vld [vmem:[%s1694_s0 + $0x10] sm:$0xff]  ;;  %v1327_v2 = vld [vmem:[%s1694_s0 + $0x8] sm:$0xff] }
   0x2   :  { %v18_v3 = vmul.f32 %v1317_v0, %v1317_v0  ;;  %v20_v4 = vmul.f32 %v1322_v1, %v1322_v1  ;;  %v19_v5 = vmul.f32 %v1327_v2, %v1327_v2  ;;  %v1338_v6 = vld [vmem:[%s1694_s0 + $0x18] sm:$0xff]  ;;  %v47_v7 = vld [vmem:[%s1695_s1] sm:$0xff]  ;;  %v48_v8 = vld [vmem:[%s1695_s1 + $0x8] sm:$0xff] }
   0x3   :  { %v21_v9 = vmul.f32 %v1338_v6, %v1338_v6  ;;  %v49_v10 = vld [vmem:[%s1695_s1 + $0x10] sm:$0xff]  ;;  %v50_v11 = vld [vmem:[%s1695_s1 + $0x18] sm:$0xff]  ;;  %v51_v12 = vmul.f32 %v47_v7, %v47_v7  ;;  %v52_v13 = vmul.f32 %v48_v8, %v48_v8 }
   0x4   :  { %9 = vsyncpa [#allocation3], 0  ;;  %v23_v14 = vsel %vm22_vm0, %v18_v3, 0.0  ;;  %v29_v15 = vsel %vm22_vm0, %v20_v4, 0.0  ;;  %v53_v16 = vmul.f32 %v49_v10, %v49_v10  ;;  %v54_v17 = vmul.f32 %v50_v11, %v50_v11  ;;  %s1287_s0 = smov 1   ;;  %s1288_s1 = smov 127  }
   0x5   :  { %24 = vadd.xlane.f32.xlu0 %v23_v14  ;;  %30 = vadd.xlane.f32.xlu1 %v29_v15  ;;  %v56_v18 = vsel %vm55_vm1, %v51_v12, 0.0  ;;  %v57_v19 = vsel %vm55_vm1, %v52_v13, 0.0  ;;  %v26_v20 = vsel %vm22_vm0, %v19_v5, 0.0  ;;  %v32_v21 = vsel %vm22_vm0, %v21_v9, 0.0  ;;  %s1292_s28 = smov 123   ;;  %s1064_s11 = sshll.u32 %s1696_s2, 4  ;;  %s1065_s11 = int_to_ptr.vmem [resolvable:$true] %s1064_s11 }
   0x6   :  { %v58_v22 = vadd.f32 %v57_v19, %v56_v18  ;;  %v59_v23 = vsel %vm55_vm1, %v53_v16, 0.0  ;;  %v61_v24 = vsel %vm55_vm1, %v54_v17, 0.0  ;;  %v192_v37 = vlaneseq  ;;  %p1278_p2 = scmp.lt.s32.totalorder %s1065_s11, %s1065_s11 }
   0x7   :  { %v1289_v58 = vmov 0.0   ;;  %vm188_vm2 = vcmask 39944   ;;  %vm172_vm4 = vcmask 7168   ;;  %vm262_vm6 = vcmask 64512  }
   0x8   :  { %v60_v25 = vadd.f32 %v59_v23, %v58_v22  ;;  %v1371_v39 = vand.u32 127, %v192_v37  ;;  %vm212_vm8 = vcmask 31744   ;;  %vm708_vm9 = vcmask 105512  }
   0x9   :  { %27 = vadd.xlane.f32.xlu0 %v26_v20  ;;  %33 = vadd.xlane.f32.xlu1 %v32_v21  ;;  %vm1291_vm10 = vmmov 0   ;;  %vm894_vm14 = vcmask 24576  }
   0xa   :  { %v62_v26 = vadd.f32 %v61_v24, %v60_v25  ;;  %v194_v41 = vcvt.s32.f32 %v1371_v39 }
   0xc   :  { %v63_v27 = vrot.slane %v62_v26, 4 }
   0xe   :  { %v64_v28 = vadd.f32 %v63_v27, %v62_v26 }
  0x10   :  { %v65_v29 = vrot.slane %v64_v28, 2 }
  0x12   :  { %v66_v30 = vadd.f32 %v65_v29, %v64_v28 }
  0x14   :  { %v67_v31 = vrot.slane %v66_v30, 1 }
  0x16   :  { %v68_v32 = vadd.f32 %v67_v31, %v66_v30 }
  0x18   :  { %v69_v33 = vmax.f32 %v68_v32, 1e-24 }
  0x1a   :  { %1189 = vrsqrt.f32 %v69_v33  ;;  %197 = vrot.lane.b32.xlu1 %v194_v41, %s1287_s0 }
  0x27   :  { %v1190_v34 = vpop.eup %1189 }
  0x28   :  { %v1362_v35 = vmul.f32 %v1190_v34, %v50_v11  ;;  %v1364_v36 = vmul.f32 %v1190_v34, %v49_v10  ;;  %v1367_v38 = vmul.f32 %v1190_v34, %v48_v8  ;;  %v1374_v40 = vmul.f32 %v1190_v34, %v47_v7 }
  0x2a   :  { %1116 = vmatprep.subr.mxu0 %v1362_v35 }
  0x2b   :  { %1117 = vmatpush3.msra.mxu0 %v1362_v35 }
  0x2c   :  { %1118 = vmatprep.subr.mxu0 %v1364_v36 }
  0x2d   :  { %1119 = vmatpush3.msra.mxu0 %v1364_v36 }
  0x2e   :  { %1120 = vmatprep.subr.mxu0 %v1367_v38 }
  0x2f   :  { %1121 = vmatpush3.msra.mxu0 %v1367_v38 }
  0x30   :  { %1122 = vmatprep.subr.mxu0 %v1374_v40 }
  0x31   :  { %1123 = vmatpush3.msra.mxu0 %v1374_v40 }
  0x32   :  { %1155 = vmatprep.subr.mxu0 %v1289_v58 }
  0x43   :  { %230 = vxpose.xlu1.b32.start.end [1/1] (short) (narrow) %v1338_v6, 32 }
  0x6d   :  { %391 = vrot.lane.b32.xlu1 %v1364_v36, %s1288_s1 }
  0x8e   :  { %v25_v42 = vpop.xlane.xlu0 %24  ;;  %v31_v43 = vpop.xlane.xlu1 %30 }
  0x8f   :  { %v35_v44 = vmax.f32 %v25_v42, 1e-24  ;;  %v37_v45 = vmax.f32 %v31_v43, 1e-24 }
  0x91   :  { %1191 = vrsqrt.f32 %v35_v44 }
  0x92   :  { %1193 = vrsqrt.f32 %v37_v45  ;;  %v28_v46 = vpop.xlane.xlu0 %27  ;;  %v34_v47 = vpop.xlane.xlu1 %33 }
  0x93   :  { %v36_v48 = vmax.f32 %v28_v46, 1e-24  ;;  %v38_v49 = vmax.f32 %v34_v47, 1e-24 }
  0x95   :  { %1195 = vrsqrt.f32 %v36_v48 }
  0x96   :  { %1197 = vrsqrt.f32 %v38_v49  ;;  %v198_v3 = vpop.permute.xlu1 %197 }
  0x9e   :  { %v1192_v50 = vpop.eup %1191 }
  0x9f   :  { %v1194_v51 = vpop.eup %1193  ;;  %v43_v52 = vmul.f32 %v1192_v50, %v1317_v0 }
  0xa0   :  { %v1391_v54 = vmul.f32 %v1194_v51, %v1322_v1  ;;  %v1290_v1 = vmov 0  }
  0xa1   :  { %1124 = vmatprep.mubr.msk.f32.mxu0 %vm22_vm0, %v43_v52  ;;  %1187 = vset.pattern.permute.xlu0 %v1290_v1 }
  0xa2   :  { %v1196_v53 = vpop.eup %1195 }
  0xa3   :  { %v1198_v55 = vpop.eup %1197  ;;  %v1394_v56 = vmul.f32 %v1196_v53, %v1327_v2 }
  0xa4   :  { %v1399_v57 = vmul.f32 %v1198_v55, %v1338_v6 }
  0xa5   :  { %1125 = vmatmul.mubr.msk.f32.vlgmr.msra.gmra.mxu0 %vm22_vm0, %v1394_v56 }
  0xa6   :  { %1127 = vmatprep.mubr.msk.f32.mxu0 %vm22_vm0, %v1391_v54 }
  0xa9   :  { %1128 = vmatmul.mubr.msk.f32.gmra.mxu0 %vm22_vm0, %v1399_v57 }
  0xaa   :  { %1163 = vmatprep.mubr.msk.f32.mxu0 %vm1291_vm10, %v1289_v58 }
  0xbf   :  { %v246_v6 = vpop.trf.xlu1 }
  0xc0   :  { %1132 = vmatprep.mubr.msk.f32.mxu1 %vm262_vm6, %v246_v6 }
  0xc3   :  { %v247_v8 = vpop.trf.xlu1 }
  0xc7   :  { %v248_v12 = vpop.trf.xlu1 }
  0xcb   :  { %v249_v13 = vpop.trf.xlu1 }
  0xdf   :  { %v1444_v51 = vpop.permute.xlu1 %391 }
 0x165   :  { %v1406_v59 = vpop.f32.mrf.mxu0 }
 0x167   :  { %v1408_v60 = vpop.f32.mrf.mxu0 }
 0x169   :  { %v1129_v61 = vpop.f32.mrf.mxu0 }
 0x16a   :  { %v189_v62 = vsel %vm188_vm2, %v1129_v61, -inf  ;;  %vm185_vm3 = vcmp.lt.f32.partialorder %v1129_v61, 0.7 }
 0x16b   :  { %190 = vmax.xlane.f32.xlu0 %v189_v62  ;;  %v1081_v63 = vsel %vm185_vm3, 1.0, %v1289_v58 }
 0x16c   :  { %v220_v0 = vsel %vm172_vm4, %v1081_v63, 0.0 }
 0x16d   :  { %221 = vadd.xlane.f32.xlu1 %v220_v0 }
 0x1f4   :  { %v191_v2 = vpop.xlane.xlu0 %190 }
 0x1f5   :  { %vm195_vm5 = vcmp.ge.f32.partialorder %v1129_v61, %v191_v2  ;;  %v173_v2 = vsel %vm172_vm4, %v1408_v60, 0.0 }
 0x1f6   :  { %v200_v4 = vsel %vm195_vm5, %v198_v3, 4.0  ;;  %v1455_v3 = vpop.f32.mrf.mxu0 }
 0x1f7   :  { %v201_v5 = vsel %vm188_vm2, %v200_v4, inf  ;;  %v703_v4 = vmul.f32 20.0, %v1455_v3 }
 0x1f8   :  { %202 = vmin.xlane.f32.xlu0 %v201_v5  ;;  %v702_v5 = vmul.f32 20.0, %v1406_v59 }
 0x1f9   :  { %v706_v6 = vmul.f32 1.442695, %v703_v4 }
 0x20e   :  { %208 = vperm.xlu0 %1187, %v1081_v63  }
 0x212   :  { %387 = vrot.lane.b32.xlu0 %v1374_v40, %s1288_s1 }
 0x216   :  { %389 = vrot.lane.b32.xlu0 %v1367_v38, %s1288_s1 }
 0x21a   :  { %393 = vrot.lane.b32.xlu0 %v1362_v35, %s1288_s1 }
 0x281   :  { %v203_v7 = vpop.xlane.xlu0 %202 }
 0x282   :  { %vm204_vm7 = vcmp.eq.f32.partialorder %v194_v41, %v203_v7  ;;  %v704_v7 = vmul.f32 1.442695, %v702_v5 }
 0x283   :  { %v205_v9 = vsel %vm204_vm7, 1.0, %v1289_v58 }
 0x289   :  { %v209_v10 = vpop.permute.xlu0 %208 }
 0x28a   :  { %v1425_v11 = vmul.f32 %v209_v10, %v205_v9 }
 0x28c   :  { %1130 = vmatprep.subr.mxu1 %v1425_v11 }
 0x28d   :  { %1131 = vmatpush3.msra.mxu1 %v1425_v11  ;;  %v1437_v42 = vpop.permute.xlu0 %387 }
 0x28e   :  { %1133 = vmatmul.mubr.msk.f32.vlgmr.msra.gmra.mxu1 %vm262_vm6, %v247_v8  ;;  %1138 = vmatprep.subr.mxu1 %v1289_v58 }
 0x28f   :  { %1135 = vmatprep.mubr.msk.f32.mxu1 %vm262_vm6, %v248_v12 }
 0x291   :  { %v1440_v47 = vpop.permute.xlu0 %389 }
 0x292   :  { %1136 = vmatmul.mubr.msk.f32.gmra.mxu1 %vm262_vm6, %v249_v13 }
 0x293   :  { %1146 = vmatprep.mubr.msk.f32.mxu1 %vm1291_vm10, %v1289_v58 }
 0x295   :  { %v1447_v61 = vpop.permute.xlu0 %393 }
 0x34e   :  { %v1134_v14 = vpop.f32.mrf.mxu1 }
 0x34f   :  { %v361_v16 = vmul.f32 %v1134_v14, %v1134_v14 }
 0x350   :  { %v341_v15 = vpop.f32.mrf.mxu1 }
 0x351   :  { %v360_v17 = vmul.f32 %v341_v15, %v341_v15  ;;  %v365_v21 = vsel %vm212_vm8, %v361_v16, 0.0 }
 0x352   :  { %v1137_v18 = vpop.f32.mrf.mxu1 }
 0x353   :  { %v364_v19 = vsel %vm212_vm8, %v360_v17, 0.0  ;;  %v363_v22 = vmul.f32 %v1137_v18, %v1137_v18 }
 0x354   :  { %v351_v20 = vpop.f32.mrf.mxu1  ;;  %v366_v24 = vadd.f32 %v365_v21, %v364_v19 }
 0x355   :  { %v362_v23 = vmul.f32 %v351_v20, %v351_v20  ;;  %v369_v27 = vsel %vm212_vm8, %v363_v22, 0.0 }
 0x357   :  { %v367_v25 = vsel %vm212_vm8, %v362_v23, 0.0 }
 0x358   :  { %v368_v26 = vadd.f32 %v367_v25, %v366_v24 }
 0x35a   :  { %v370_v28 = vadd.f32 %v369_v27, %v368_v26 }
 0x35c   :  { %v371_v29 = vrot.slane %v370_v28, 4 }
 0x35e   :  { %v372_v30 = vadd.f32 %v371_v29, %v370_v28 }
 0x360   :  { %v373_v31 = vrot.slane %v372_v30, 2 }
 0x362   :  { %v374_v32 = vadd.f32 %v373_v31, %v372_v30 }
 0x364   :  { %v375_v33 = vrot.slane %v374_v32, 1 }
 0x366   :  { %v376_v34 = vadd.f32 %v375_v33, %v374_v32 }
 0x368   :  { %v377_v41 = vmax.f32 %v376_v34, 1e-24 }
 0x36a   :  { %1199 = vrsqrt.f32 %v377_v41 }
 0x36b   :  { %1201 = vpow2.f32 %v706_v6 }
 0x36c   :  { %1203 = vpow2.f32 %v704_v7 }
 0x377   :  { %v1200_v43 = vpop.eup %1199 }
 0x378   :  { %v379_v44 = vmul.f32 %v1200_v43, %v341_v15  ;;  %v380_v45 = vmul.f32 %v1200_v43, %v1134_v14  ;;  %v381_v48 = vmul.f32 %v1200_v43, %v351_v20  ;;  %v382_v55 = vmul.f32 %v1200_v43, %v1137_v18  ;;  %v1202_v16 = vpop.eup %1201 }
 0x379   :  { %v1204_v19 = vpop.eup %1203  ;;  %v710_v21 = vsel %vm708_vm9, %v1202_v16, 0.0 }
 0x37a   :  { %v399_v46 = vsub.f32 %v379_v44, %v1437_v42  ;;  %v400_v50 = vsub.f32 %v380_v45, %v1440_v47  ;;  %v401_v52 = vsub.f32 %v381_v48, %v1444_v51  ;;  %v402_v62 = vsub.f32 %v382_v55, %v1447_v61 }
 0x37b   :  { %v709_v26 = vsel %vm708_vm9, %v1204_v19, 0.0 }
 0x37c   :  { %v403_v49 = vmul.f32 0.1, %v399_v46  ;;  %v404_v53 = vmul.f32 0.1, %v400_v50  ;;  %v405_v63 = vmul.f32 0.1, %v401_v52  ;;  %v711_v28 = vadd.f32 %v710_v21, %v709_v26 }
 0x37d   :  { %v406_v0 = vmul.f32 0.1, %v402_v62 }
 0x37e   :  { %411 = vrot.lane.b32.xlu0 %v403_v49, %s1287_s0  ;;  %v712_v32 = vrot.slane %v711_v28, 4 }
 0x380   :  { %v713_v41 = vadd.f32 %v712_v32, %v711_v28 }
 0x382   :  { %413 = vrot.lane.b32.xlu0 %v404_v53, %s1287_s0  ;;  %v714_v45 = vrot.slane %v713_v41, 2 }
 0x384   :  { %v715_v50 = vadd.f32 %v714_v45, %v713_v41 }
 0x386   :  { %415 = vrot.lane.b32.xlu0 %v405_v63, %s1287_s0  ;;  %v716_v52 = vrot.slane %v715_v50, 1 }
 0x388   :  { %v717_v53 = vadd.f32 %v716_v52, %v715_v50 }
 0x38a   :  { %417 = vrot.lane.b32.xlu0 %v406_v0, %s1287_s0 }
 0x3a9   :  { %174 = vadd.xlane.f32.xlu0 %v173_v2  ;;  %v222_v2 = vpop.xlane.xlu1 %221 }
 0x3aa   :  { %v223_v6 = vrot.slane %v222_v2, 4 }
 0x3f0   :  { %v412_v8 = vpop.permute.xlu0 %411 }
 0x3f1   :  { %v423_v10 = vadd.f32 %v412_v8, %v1374_v40  ;;  %v224_v8 = vadd.f32 %v223_v6, %v222_v2 }
 0x3f3   :  { %v427_v60 = vmul.f32 %v423_v10, %v423_v10 }
 0x3f4   :  { %v414_v9 = vpop.permute.xlu0 %413 }
 0x3f5   :  { %v424_v12 = vadd.f32 %v414_v9, %v1367_v38  ;;  %v431_v22 = vsel %vm188_vm2, %v427_v60, 0.0 }
 0x3f7   :  { %v428_v13 = vmul.f32 %v424_v12, %v424_v12 }
 0x3f8   :  { %v416_v14 = vpop.permute.xlu0 %415 }
 0x3f9   :  { %v425_v15 = vadd.f32 %v416_v14, %v1364_v36  ;;  %v432_v17 = vsel %vm188_vm2, %v428_v13, 0.0 }
 0x3fa   :  { %v433_v25 = vadd.f32 %v432_v17, %v431_v22 }
 0x3fb   :  { %v429_v18 = vmul.f32 %v425_v15, %v425_v15 }
 0x3fc   :  { %v418_v20 = vpop.permute.xlu0 %417 }
 0x3fd   :  { %v434_v23 = vsel %vm188_vm2, %v429_v18, 0.0  ;;  %v426_v24 = vadd.f32 %v418_v20, %v1362_v35 }
 0x3fe   :  { %v435_v29 = vadd.f32 %v434_v23, %v433_v25 }
 0x3ff   :  { %v430_v27 = vmul.f32 %v426_v24, %v426_v24 }
 0x401   :  { %v436_v30 = vsel %vm188_vm2, %v430_v27, 0.0 }
 0x402   :  { %v437_v31 = vadd.f32 %v436_v30, %v435_v29 }
 0x404   :  { %v438_v33 = vrot.slane %v437_v31, 4 }
 0x406   :  { %v439_v34 = vadd.f32 %v438_v33, %v437_v31 }
 0x408   :  { %v440_v43 = vrot.slane %v439_v34, 2 }
 0x40a   :  { %v441_v44 = vadd.f32 %v440_v43, %v439_v34 }
 0x40c   :  { %v442_v46 = vrot.slane %v441_v44, 1 }
 0x40e   :  { %v443_v48 = vadd.f32 %v442_v46, %v441_v44 }
 0x410   :  { %v444_v49 = vmax.f32 %v443_v48, 1e-24 }
 0x412   :  { %1205 = vrsqrt.f32 %v444_v49 }
 0x413   :  { %1207 = vrcp.f32 %v717_v53 }
 0x41f   :  { %v1206_v55 = vpop.eup %1205 }
 0x420   :  { %v449_v62 = vmul.f32 %v1206_v55, %v426_v24  ;;  %v447_v63 = vmul.f32 %v1206_v55, %v424_v12  ;;  %v448_v0 = vmul.f32 %v1206_v55, %v425_v15  ;;  %v446_v4 = vmul.f32 %v1206_v55, %v423_v10  ;;  %v1208_v5 = vpop.eup %1207 }
 0x421   :  { %v1477_v7 = vmul.f32 %v1208_v5, %v1204_v19  ;;  %v1481_v9 = vmul.f32 %v1208_v5, %v1202_v16  ;;  %v225_v12 = vrot.slane %v224_v8, 2  ;;  %v213_v16 = vsel %vm212_vm8, %v1425_v11, 0.0 }
 0x422   :  { %468 = vrot.lane.b32.xlu0 %v449_v62, %s1288_s1  ;;  %464 = vrot.lane.b32.xlu1 %v447_v63, %s1288_s1  ;;  %v214_v22 = vrot.slane %v213_v16, 4 }
 0x423   :  { %v226_v60 = vadd.f32 %v225_v12, %v224_v8 }
 0x424   :  { %v215_v23 = vadd.f32 %v214_v22, %v213_v16 }
 0x425   :  { %v227_v18 = vrot.slane %v226_v60, 1 }
 0x426   :  { %466 = vrot.lane.b32.xlu0 %v448_v0, %s1288_s1  ;;  %v216_v24 = vrot.slane %v215_v23, 2 }
 0x427   :  { %v228_v21 = vadd.f32 %v227_v18, %v226_v60 }
 0x428   :  { %v217_v25 = vadd.f32 %v216_v24, %v215_v23 }
 0x42a   :  { %462 = vrot.lane.b32.xlu0 %v446_v4, %s1288_s1  ;;  %v218_v26 = vrot.slane %v217_v25, 1 }
 0x42c   :  { %v219_v28 = vadd.f32 %v218_v26, %v217_v25 }
 0x42e   :  { %723 = vrot.lane.b32.xlu0 %v1477_v7, %s1292_s28  ;;  %vm450_vm12 = vcmp.ge.f32.partialorder %v219_v28, 3.0 }
 0x432   :  { %v175_v13 = vpop.xlane.xlu0 %174  ;;  %725 = vrot.lane.b32.xlu0 %v1481_v9, %s1292_s28 }
 0x433   :  { %v176_v14 = vrot.slane %v175_v13, 4 }
 0x435   :  { %v177_v10 = vadd.f32 %v176_v14, %v175_v13 }
 0x437   :  { %v178_v15 = vrot.slane %v177_v10, 2 }
 0x439   :  { %v179_v17 = vadd.f32 %v178_v15, %v177_v10 }
 0x43b   :  { %v180_v19 = vrot.slane %v179_v17, 1 }
 0x43d   :  { %v181_v20 = vadd.f32 %v180_v19, %v179_v17 }
 0x43f   :  { %1166 = vpush %v181_v20 }
 0x440   :  { %1168 = vpush %v228_v21 }
 0x470   :  { %s1167_s29 = spop %1166 }
 0x471   :  { %s183_s30 = smul.f32 0.16666667, %s1167_s29  ;;  %s1169_s5 = spop %1168 }
 0x472   :  { %p451_p0 = scmp.gt.f32.partialorder %s1169_s5, 0.0 }
 0x473   :  { %s1485_s4 = ssub.f32 1.0, %s183_s30 }
 0x474   :  { %s452_s6 = scalar_select %p451_p0, 1, 0 }
 0x475   :  { %1047 = sst [smem:[#allocation2 + $0x1]] %s1485_s4  ;;  %s1037_s25 = smul.f32 0.45, %s1485_s4 }
 0x476   :  { %v453_v27 = vstv %s452_s6  ;;  %s1273_s4 = scalar_lea.vmem %s1065_s11, 16 }
 0x477   :  { %vm454_vm11 = vcmp.eq.s32.totalorder %v453_v27, 1  ;;  %p1274_p1 = scmp.ne.s32.totalorder %s1065_s11, %s1273_s4  ;;  %p1279_p3 = scmp.lt.s32.totalorder %s1273_s4, %s1273_s4 }
 0x478   :  { %vm1490_vm13 = vmand %vm450_vm12, %vm454_vm11 }
 0x479   :  { %p1280_p4 = por %p1279_p3, %p1278_p2 }
 0x47b   :  { %p1281_p5 = pnand %p1280_p4, %p1274_p1 }
 0x494   :  { %v469_v30 = vpop.permute.xlu0 %468  ;;  %v465_v31 = vpop.permute.xlu1 %464 }
 0x495   :  { %v1497_v11 = vsel %vm1490_vm13, %v469_v30, %v1447_v61  ;;  %v1502_v32 = vsel %vm1490_vm13, %v465_v31, %v1440_v47  ;;  %v800_v30 = vmul.f32 10.0, %v1455_v3  ;;  %v799_v3 = vmul.f32 10.0, %v1406_v59 }
 0x496   :  { %1057 = vst.msk [vmem:[%s1697_s3 + $0x18] sm:$0xff] %vm212_vm8, %v1497_v11  ;;  %1055 = vst.msk [vmem:[%s1697_s3 + $0x8] sm:$0xff] %vm212_vm8, %v1502_v32  ;;  %1139 = vmatpush3.msra.mxu1 %v1497_v11  ;;  %1156 = vmatpush3.msra.mxu0 %v1497_v11 }
 0x497   :  { %1140 = vmatprep.subr.mxu1 %v1289_v58  ;;  %1157 = vmatprep.subr.mxu0 %v1289_v58 }
 0x498   :  { %v467_v47 = vpop.permute.xlu0 %466 }
 0x499   :  { %v1521_v61 = vsel %vm1490_vm13, %v467_v47, %v1444_v51 }
 0x49a   :  { %1056 = vst.msk [vmem:[%s1697_s3 + $0x10] sm:$0xff] %vm212_vm8, %v1521_v61  ;;  %1141 = vmatpush3.msra.mxu1 %v1521_v61  ;;  %1158 = vmatpush3.msra.mxu0 %v1521_v61 }
 0x49b   :  { %1142 = vmatprep.subr.mxu1 %v1289_v58  ;;  %1159 = vmatprep.subr.mxu0 %v1289_v58 }
 0x49c   :  { %v463_v33 = vpop.permute.xlu0 %462  ;;  %1143 = vmatpush3.msra.mxu1 %v1502_v32  ;;  %1160 = vmatpush3.msra.mxu0 %v1502_v32 }
 0x49d   :  { %v1537_v51 = vsel %vm1490_vm13, %v463_v33, %v1437_v42  ;;  %1144 = vmatprep.subr.mxu1 %v1289_v58  ;;  %1161 = vmatprep.subr.mxu0 %v1289_v58  ;;  %v804_v33 = vsel %vm708_vm9, %v800_v30, -inf }
 0x49e   :  { %1054 = vst.msk [vmem:[%s1697_s3] sm:$0xff] %vm212_vm8, %v1537_v51  ;;  %1145 = vmatpush3.msra.mxu1 %v1537_v51  ;;  %1162 = vmatpush3.msra.mxu0 %v1537_v51 }
 0x49f   :  { %1147 = vmatmul.mubr.msk.f32.vlgmr.msra.gmra.mxu1 %vm22_vm0, %v1394_v56 }
 0x4a0   :  { %v724_v34 = vpop.permute.xlu0 %723  ;;  %1149 = vmatprep.mubr.msk.f32.mxu1 %vm1291_vm10, %v1289_v58 }
 0x4a1   :  { %v729_v42 = vsel %vm262_vm6, %v724_v34, 0.0 }
 0x4a2   :  { %730 = vadd.xlane.f32.xlu0 %v729_v42 }
 0x4a3   :  { %1150 = vmatmul.mubr.msk.f32.gmra.mxu1 %vm22_vm0, %v1391_v54 }
 0x4a4   :  { %v726_v41 = vpop.permute.xlu0 %725  ;;  %1152 = vmatprep.mubr.msk.f32.mxu1 %vm1291_vm10, %v1289_v58 }
 0x4a5   :  { %v732_v43 = vsel %vm262_vm6, %v726_v41, 0.0 }
 0x4a6   :  { %733 = vadd.xlane.f32.xlu1 %v732_v43 }
 0x4a7   :  { %1153 = vmatmul.mubr.msk.f32.gmra.mxu1 %vm22_vm0, %v1399_v57 }
 0x52b   :  { %v731_v56 = vpop.xlane.xlu0 %730 }
 0x52c   :  { %1209 = vrcp.f32 %v731_v56  ;;  %v801_v56 = vsel %vm708_vm9, %v799_v3, -inf }
 0x52f   :  { %v734_v44 = vpop.xlane.xlu1 %733 }
 0x530   :  { %1211 = vrcp.f32 %v734_v44 }
 0x539   :  { %v1210_v45 = vpop.eup %1209 }
 0x53a   :  { %v736_v46 = vmul.f32 %v1210_v45, %v1477_v7 }
 0x53c   :  { %v739_v49 = vsel %vm708_vm9, %v736_v46, 0.0 }
 0x53d   :  { %v1212_v48 = vpop.eup %1211 }
 0x53e   :  { %v738_v54 = vmul.f32 %v1212_v48, %v1481_v9 }
 0x540   :  { %v740_v50 = vsel %vm708_vm9, %v738_v54, 0.0 }
 0x541   :  { %v741_v52 = vadd.f32 %v740_v50, %v739_v49 }
 0x543   :  { %v742_v53 = vrot.slane %v741_v52, 4 }
 0x545   :  { %v743_v55 = vadd.f32 %v742_v53, %v741_v52 }
 0x547   :  { %v744_v62 = vrot.slane %v743_v55, 2 }
 0x549   :  { %v745_v63 = vadd.f32 %v744_v62, %v743_v55 }
 0x54b   :  { %v746_v57 = vrot.slane %v745_v63, 1 }
 0x54d   :  { %v747_v0 = vadd.f32 %v746_v57, %v745_v63 }
 0x54f   :  { %1213 = vrcp.f32 %v747_v0 }
 0x55c   :  { %v1214_v2 = vpop.eup %1213 }
 0x55d   :  { %v1564_v4 = vmul.f32 %v1214_v2, %v738_v54  ;;  %v1566_v5 = vmul.f32 %v1214_v2, %v736_v46 }
 0x55f   :  { %v1568_v6 = vpop.f32.mrf.mxu1  ;;  %755 = vrot.lane.b32.xlu1 %v1564_v4, %s1292_s28  ;;  %753 = vrot.lane.b32.xlu0 %v1566_v5, %s1292_s28 }
 0x560   :  { %v588_v7 = vmul.f32 20.0, %v1568_v6 }
 0x561   :  { %v1148_v8 = vpop.f32.mrf.mxu1 }
 0x562   :  { %v590_v9 = vmul.f32 1.442695, %v588_v7 }
 0x563   :  { %v1575_v12 = vpop.f32.mrf.mxu1 }
 0x564   :  { %v589_v13 = vmul.f32 20.0, %v1575_v12  ;;  %1215 = vpow2.f32 %v590_v9  ;;  %v663_v45 = vsel %vm212_vm8, %v1575_v12, -inf }
 0x565   :  { %v1151_v14 = vpop.f32.mrf.mxu1 }
 0x566   :  { %v592_v10 = vmul.f32 1.442695, %v589_v13 }
 0x567   :  { %v1578_v60 = vpop.f32.mrf.mxu1 }
 0x568   :  { %1217 = vpow2.f32 %v592_v10  ;;  %v558_v44 = vsel %vm212_vm8, %v1578_v60, -inf }
 0x569   :  { %v1154_v15 = vpop.f32.mrf.mxu1 }
 0x571   :  { %v1216_v17 = vpop.eup %1215 }
 0x572   :  { %v594_v19 = vsel %vm212_vm8, %v1216_v17, 0.0 }
 0x575   :  { %v1218_v18 = vpop.eup %1217 }
 0x576   :  { %v595_v20 = vsel %vm212_vm8, %v1218_v18, 0.0 }
 0x577   :  { %v596_v21 = vadd.f32 %v595_v20, %v594_v19 }
 0x579   :  { %v597_v16 = vrot.slane %v596_v21, 4 }
 0x57b   :  { %v598_v22 = vadd.f32 %v597_v16, %v596_v21 }
 0x57d   :  { %v599_v23 = vrot.slane %v598_v22, 2 }
 0x57f   :  { %v600_v24 = vadd.f32 %v599_v23, %v598_v22 }
 0x581   :  { %v601_v25 = vrot.slane %v600_v24, 1 }
 0x583   :  { %v602_v26 = vadd.f32 %v601_v25, %v600_v24 }
 0x585   :  { %1219 = vrcp.f32 %v602_v26 }
 0x592   :  { %v1220_v27 = vpop.eup %1219 }
 0x593   :  { %v605_v28 = vmul.f32 %v1220_v27, %v1218_v18  ;;  %v604_v29 = vmul.f32 %v1220_v27, %v1216_v17 }
 0x595   :  { %v609_v31 = vsel %vm212_vm8, %v605_v28, 0.0  ;;  %v606_v47 = vsel %vm212_vm8, %v604_v29, 0.0 }
 0x596   :  { %610 = vadd.xlane.f32.xlu1 %v609_v31  ;;  %607 = vadd.xlane.f32.xlu0 %v606_v47 }
 0x59a   :  { %805 = vmax.xlane.f32.xlu1 %v804_v33 }
 0x5cd   :  { %907 = vxpose.xlu1.b32.start [1/4] (short) (narrow) %v1537_v51, 8 }
 0x5d1   :  { %908 = vxpose.xlu1.b32.cont [2/4] (short) (narrow) %v1502_v32, 8  ;;  %v754_v34 = vpop.permute.xlu0 %753  ;;  %v756_v41 = vpop.permute.xlu1 %755 }
 0x5d2   :  { %v759_v42 = vsel %vm262_vm6, %v754_v34, 0.0  ;;  %v762_v43 = vsel %vm262_vm6, %v756_v41, 0.0 }
 0x5d3   :  { %760 = vadd.xlane.f32.xlu0 %v759_v42 }
 0x5d5   :  { %909 = vxpose.xlu1.b32.cont [3/4] (short) (narrow) %v1521_v61, 8 }
 0x5d7   :  { %763 = vadd.xlane.f32.xlu0 %v762_v43 }
 0x5d9   :  { %910 = vxpose.xlu1.b32.end [4/4] (short) (narrow) %v1497_v11, 8 }
 0x5db   :  { %802 = vmax.xlane.f32.xlu0 %v801_v56 }
 0x5df   :  { %559 = vmax.xlane.f32.xlu0 %v558_v44 }
 0x5f7   :  { %1188 = vset.pattern.permute.xlu1 %v1290_v1 }
 0x600   :  { %664 = vmax.xlane.f32.xlu1 %v663_v45 }
 0x611   :  { %862 = vperm.xlu1 %1188, %v1367_v38  }
 0x615   :  { %870 = vperm.xlu1 %1188, %v1362_v35  }
 0x61f   :  { %v611_v59 = vpop.xlane.xlu1 %610  ;;  %v608_v54 = vpop.xlane.xlu0 %607 }
 0x623   :  { %v806_v46 = vpop.xlane.xlu1 %805 }
 0x624   :  { %v1602_v1 = vsub.f32 %v800_v30, %v806_v46 }
 0x626   :  { %v811_v35 = vmul.f32 1.442695, %v1602_v1 }
 0x649   :  { %v923_v48 = vpop.trf.xlu1 }
 0x64a   :  { %1164 = vmatmul.mubr.msk.f32.vlgmr.msra.gmra.mxu0 %vm22_vm0, %v923_v48  ;;  %v660_v48 = vsel %vm212_vm8, %v1568_v6, -inf  ;;  %vm1023_vm0 = vcmask 27648  }
 0x65c   :  { %v761_v49 = vpop.xlane.xlu0 %760 }
 0x65d   :  { %1221 = vrcp.f32 %v761_v49 }
 0x660   :  { %v764_v50 = vpop.xlane.xlu0 %763 }
 0x661   :  { %1223 = vrcp.f32 %v764_v50 }
 0x662   :  { %1225 = vrcp.f32 %v611_v59 }
 0x663   :  { %1227 = vrcp.f32 %v608_v54 }
 0x664   :  { %v803_v52 = vpop.xlane.xlu0 %802 }
 0x665   :  { %v1604_v53 = vsub.f32 %v799_v3, %v803_v52 }
 0x667   :  { %v809_v38 = vmul.f32 1.442695, %v1604_v53 }
 0x668   :  { %v560_v45 = vpop.xlane.xlu0 %559 }
 0x669   :  { %1229 = vpow2.f32 %v809_v38  ;;  %v1632_v59 = vsub.f32 %v1578_v60, %v560_v45 }
 0x66a   :  { %v1222_v55 = vpop.eup %1221  ;;  %1231 = vpow2.f32 %v811_v35 }
 0x66b   :  { %v766_v62 = vmul.f32 %v1222_v55, %v1566_v5  ;;  %v562_v46 = vmul.f32 1.442695, %v1632_v59 }
 0x66d   :  { %v769_v0 = vsel %vm708_vm9, %v766_v62, 0.0 }
 0x66e   :  { %v1224_v63 = vpop.eup %1223 }
 0x66f   :  { %v768_v57 = vmul.f32 %v1224_v63, %v1564_v4  ;;  %v1226_v8 = vpop.eup %1225 }
 0x670   :  { %v1228_v9 = vpop.eup %1227  ;;  %v615_v17 = vmul.f32 %v1226_v8, %v605_v28 }
 0x671   :  { %v770_v2 = vsel %vm708_vm9, %v768_v57, 0.0  ;;  %v613_v15 = vmul.f32 %v1228_v9, %v604_v29 }
 0x672   :  { %v771_v7 = vadd.f32 %v770_v2, %v769_v0  ;;  %v617_v20 = vsel %vm212_vm8, %v615_v17, 0.0 }
 0x673   :  { %v616_v4 = vsel %vm212_vm8, %v613_v15, 0.0 }
 0x674   :  { %v772_v13 = vrot.slane %v771_v7, 4  ;;  %v618_v22 = vadd.f32 %v617_v20, %v616_v4 }
 0x676   :  { %v1230_v14 = vpop.eup %1229  ;;  %v773_v10 = vadd.f32 %v772_v13, %v771_v7  ;;  %v619_v23 = vrot.slane %v618_v22, 4 }
 0x677   :  { %815 = vrot.lane.b32.xlu0 %v1230_v14, %s1292_s28  ;;  %v1232_v19 = vpop.eup %1231 }
 0x678   :  { %v774_v18 = vrot.slane %v773_v10, 2  ;;  %v620_v24 = vadd.f32 %v619_v23, %v618_v22 }
 0x67a   :  { %v775_v5 = vadd.f32 %v774_v18, %v773_v10  ;;  %v621_v27 = vrot.slane %v620_v24, 2 }
 0x67b   :  { %817 = vrot.lane.b32.xlu0 %v1232_v19, %s1292_s28 }
 0x67c   :  { %v776_v21 = vrot.slane %v775_v5, 1  ;;  %v622_v31 = vadd.f32 %v621_v27, %v620_v24 }
 0x67e   :  { %v777_v16 = vadd.f32 %v776_v21, %v775_v5  ;;  %v623_v33 = vrot.slane %v622_v31, 1 }
 0x680   :  { %1233 = vrcp.f32 %v777_v16  ;;  %v624_v34 = vadd.f32 %v623_v33, %v622_v31 }
 0x689   :  { %v665_v25 = vpop.xlane.xlu1 %664 }
 0x68a   :  { %v1617_v26 = vsub.f32 %v1575_v12, %v665_v25 }
 0x68c   :  { %v670_v28 = vmul.f32 1.442695, %v1617_v26 }
 0x68d   :  { %v1234_v29 = vpop.eup %1233 }
 0x68e   :  { %1235 = vpow2.f32 %v670_v28  ;;  %v1620_v30 = vmul.f32 %v1234_v29, %v766_v62  ;;  %v1622_v47 = vmul.f32 %v1234_v29, %v768_v57 }
 0x68f   :  { %1237 = vrcp.f32 %v624_v34 }
 0x690   :  { %783 = vrot.lane.b32.xlu0 %v1620_v30, %s1292_s28  ;;  %1239 = vpow2.f32 %v562_v46 }
 0x69b   :  { %v1236_v42 = vpop.eup %1235 }
 0x69c   :  { %v675_v12 = vsel %vm212_vm8, %v1236_v42, 0.0  ;;  %v1238_v41 = vpop.eup %1237 }
 0x69d   :  { %676 = vadd.xlane.f32.xlu1 %v675_v12  ;;  %v626_v3 = vmul.f32 %v1238_v41, %v613_v15  ;;  %v627_v56 = vmul.f32 %v1238_v41, %v615_v17  ;;  %v1240_v54 = vpop.eup %1239 }
 0x69e   :  { %v564_v50 = vsel %vm212_vm8, %v1240_v54, 0.0 }
 0x69f   :  { %v628_v43 = vsel %vm212_vm8, %v626_v3, 0.0  ;;  %v631_v44 = vsel %vm212_vm8, %v627_v56, 0.0 }
 0x6af   :  { %629 = vadd.xlane.f32.xlu0 %v628_v43 }
 0x6b3   :  { %632 = vadd.xlane.f32.xlu0 %v631_v44 }
 0x6c9   :  { %785 = vrot.lane.b32.xlu0 %v1622_v47, %s1292_s28 }
 0x6e8   :  { %661 = vmax.xlane.f32.xlu0 %v660_v48 }
 0x6e9   :  { %v816_v49 = vpop.permute.xlu0 %815 }
 0x6ea   :  { %v821_v52 = vsel %vm262_vm6, %v816_v49, 0.0 }
 0x6ec   :  { %565 = vadd.xlane.f32.xlu0 %v564_v50 }
 0x6ed   :  { %v818_v38 = vpop.permute.xlu0 %817 }
 0x6ee   :  { %v824_v35 = vsel %vm262_vm6, %v818_v38, 0.0 }
 0x6f0   :  { %822 = vadd.xlane.f32.xlu0 %v821_v52 }
 0x6f4   :  { %825 = vadd.xlane.f32.xlu0 %v824_v35  ;;  %v863_v35 = vpop.permute.xlu1 %862 }
 0x702   :  { %v784_v60 = vpop.permute.xlu0 %783 }
 0x703   :  { %v789_v55 = vsel %vm262_vm6, %v784_v60, 0.0 }
 0x704   :  { %790 = vadd.xlane.f32.xlu0 %v789_v55 }
 0x738   :  { %v630_v62 = vpop.xlane.xlu0 %629 }
 0x73c   :  { %v633_v63 = vpop.xlane.xlu0 %632 }
 0x73d   :  { %1241 = vrcp.f32 %v633_v63 }
 0x73e   :  { %1243 = vrcp.f32 %v630_v62  ;;  %v874_v62 = vmul.f32 %v863_v35, %v1502_v32 }
 0x740   :  { %v786_v57 = vpop.permute.xlu0 %785 }
 0x741   :  { %v792_v0 = vsel %vm262_vm6, %v786_v57, 0.0 }
 0x742   :  { %793 = vadd.xlane.f32.xlu0 %v792_v0  ;;  %v871_v0 = vpop.permute.xlu1 %870 }
 0x74a   :  { %v1242_v2 = vpop.eup %1241 }
 0x74b   :  { %v1244_v7 = vpop.eup %1243  ;;  %v637_v8 = vmul.f32 %v1242_v2, %v627_v56 }
 0x74c   :  { %v635_v9 = vmul.f32 %v1244_v7, %v626_v3 }
 0x74d   :  { %v639_v13 = vsel %vm212_vm8, %v637_v8, 0.0 }
 0x74e   :  { %v638_v14 = vsel %vm212_vm8, %v635_v9, 0.0 }
 0x74f   :  { %v640_v10 = vadd.f32 %v639_v13, %v638_v14  ;;  %v876_v14 = vmul.f32 %v871_v0, %v1497_v11 }
 0x751   :  { %v641_v15 = vrot.slane %v640_v10, 4 }
 0x753   :  { %v642_v17 = vadd.f32 %v641_v15, %v640_v10 }
 0x755   :  { %v643_v18 = vrot.slane %v642_v17, 2 }
 0x757   :  { %v644_v19 = vadd.f32 %v643_v18, %v642_v17 }
 0x758   :  { %858 = vperm.xlu0 %1187, %v1374_v40  }
 0x759   :  { %v645_v5 = vrot.slane %v644_v19, 1 }
 0x75b   :  { %v646_v4 = vadd.f32 %v645_v5, %v644_v19 }
 0x75c   :  { %866 = vperm.xlu0 %1187, %v1364_v36  }
 0x75d   :  { %1245 = vrcp.f32 %v646_v4 }
 0x76a   :  { %v1246_v40 = vpop.eup %1245 }
 0x76b   :  { %v1651_v27 = vmul.f32 %v1246_v40, %v635_v9  ;;  %v1656_v34 = vmul.f32 %v1246_v40, %v637_v8  ;;  %v878_v8 = vsel %vm212_vm8, %v874_v62, 0.0 }
 0x76d   :  { %v650_v33 = vsel %vm212_vm8, %v1651_v27, 0.0  ;;  %v653_v3 = vsel %vm212_vm8, %v1656_v34, 0.0 }
 0x771   :  { %v662_v20 = vpop.xlane.xlu0 %661 }
 0x772   :  { %v1647_v21 = vsub.f32 %v1568_v6, %v662_v20  ;;  %v677_v20 = vpop.xlane.xlu1 %676 }
 0x774   :  { %v668_v16 = vmul.f32 1.442695, %v1647_v21 }
 0x775   :  { %v566_v22 = vpop.xlane.xlu0 %565 }
 0x776   :  { %1247 = vpow2.f32 %v668_v16 }
 0x777   :  { %1249 = vlog2.f32 %v566_v22 }
 0x778   :  { %1251 = vrcp.f32 %v566_v22 }
 0x779   :  { %v823_v36 = vpop.xlane.xlu0 %822 }
 0x77a   :  { %1253 = vlog2.f32 %v823_v36 }
 0x77d   :  { %v826_v42 = vpop.xlane.xlu0 %825 }
 0x783   :  { %v1248_v23 = vpop.eup %1247 }
 0x784   :  { %v1250_v24 = vpop.eup %1249  ;;  %v672_v25 = vsel %vm212_vm8, %v1248_v23, 0.0 }
 0x785   :  { %v1252_v28 = vpop.eup %1251  ;;  %v568_v29 = vmul.f32 0.6931472, %v1250_v24  ;;  %673 = vadd.xlane.f32.xlu0 %v672_v25 }
 0x786   :  { %v571_v31 = vmul.f32 %v1252_v28, %v1240_v54  ;;  %v1664_v54 = vpop.f32.mrf.mxu0 }
 0x787   :  { %v569_v6 = vsub.f32 %v1632_v59, %v568_v29  ;;  %v1254_v56 = vpop.eup %1253 }
 0x788   :  { %v828_v45 = vmul.f32 0.6931472, %v1254_v56  ;;  %v1165_v49 = vpop.f32.mrf.mxu0 }
 0x789   :  { %651 = vadd.xlane.f32.xlu0 %v650_v33  ;;  %v572_v12 = vmul.f32 %v571_v31, %v569_v6 }
 0x78a   :  { %v831_v46 = vsub.f32 %v1604_v53, %v828_v45 }
 0x78b   :  { %v573_v41 = vsel %vm212_vm8, %v572_v12, 0.0 }
 0x78c   :  { %574 = vadd.xlane.f32.xlu1 %v573_v41 }
 0x78d   :  { %654 = vadd.xlane.f32.xlu0 %v653_v3  ;;  %v791_v43 = vpop.xlane.xlu0 %790 }
 0x78e   :  { %1255 = vrcp.f32 %v791_v43 }
 0x78f   :  { %1257 = vlog2.f32 %v826_v42 }
 0x79b   :  { %v1256_v44 = vpop.eup %1255 }
 0x79c   :  { %v796_v59 = vmul.f32 %v1256_v44, %v1620_v30  ;;  %v1258_v52 = vpop.eup %1257 }
 0x79d   :  { %v830_v55 = vmul.f32 0.6931472, %v1258_v52 }
 0x79e   :  { %v833_v48 = vmul.f32 %v831_v46, %v796_v59 }
 0x79f   :  { %v832_v7 = vsub.f32 %v1602_v1, %v830_v55 }
 0x7a3   :  { %837 = vrot.lane.b32.xlu0 %v833_v48, %s1292_s28  ;;  %v1017_v48 = vsub.f32 1.0, %v1664_v54 }
 0x7a5   :  { %v1018_v49 = vmax.f32 %v1017_v48, 1e-06 }
 0x7cb   :  { %v794_v50 = vpop.xlane.xlu0 %793 }
 0x7cc   :  { %1259 = vrcp.f32 %v794_v50 }
 0x7d3   :  { %v859_v38 = vpop.permute.xlu0 %858 }
 0x7d4   :  { %v873_v60 = vmul.f32 %v859_v38, %v1537_v51 }
 0x7d6   :  { %v877_v57 = vsel %vm212_vm8, %v873_v60, 0.0 }
 0x7d7   :  { %v867_v30 = vpop.permute.xlu0 %866  ;;  %v879_v13 = vadd.f32 %v878_v8, %v877_v57 }
 0x7d8   :  { %v875_v53 = vmul.f32 %v867_v30, %v1521_v61  ;;  %v882_v61 = vsel %vm212_vm8, %v876_v14, 0.0 }
 0x7d9   :  { %v1260_v63 = vpop.eup %1259 }
 0x7da   :  { %v798_v2 = vmul.f32 %v1260_v63, %v1622_v47  ;;  %v880_v9 = vsel %vm212_vm8, %v875_v53, 0.0 }
 0x7db   :  { %v881_v32 = vadd.f32 %v880_v9, %v879_v13 }
 0x7dc   :  { %v834_v51 = vmul.f32 %v832_v7, %v798_v2 }
 0x7dd   :  { %v883_v10 = vadd.f32 %v882_v61, %v881_v32 }
 0x7de   :  { %839 = vrot.lane.b32.xlu1 %v834_v51, %s1292_s28 }
 0x7df   :  { %v884_v15 = vrot.slane %v883_v10, 4 }
 0x7e1   :  { %v885_v17 = vadd.f32 %v884_v15, %v883_v10 }
 0x7e3   :  { %v886_v18 = vrot.slane %v885_v17, 2 }
 0x7e5   :  { %v887_v47 = vadd.f32 %v886_v18, %v885_v17 }
 0x7e7   :  { %v888_v19 = vrot.slane %v887_v47, 1 }
 0x7e9   :  { %v889_v1 = vadd.f32 %v888_v19, %v887_v47 }
 0x7eb   :  { %v890_v5 = vsub.f32 1.0, %v889_v1 }
 0x7ed   :  { %v891_v4 = vmax.f32 %v890_v5, 1e-06 }
 0x7ef   :  { %1261 = vlog2.f32 %v891_v4 }
 0x7fc   :  { %v1262_v22 = vpop.eup %1261 }
 0x7fd   :  { %v893_v24 = vmul.f32 0.6931472, %v1262_v22 }
 0x7ff   :  { %v895_v25 = vsel %vm894_vm14, %v893_v24, 0.0 }
 0x80e   :  { %v674_v16 = vpop.xlane.xlu0 %673 }
 0x80f   :  { %1263 = vlog2.f32 %v674_v16 }
 0x810   :  { %1265 = vlog2.f32 %v677_v20 }
 0x812   :  { %v652_v11 = vpop.xlane.xlu0 %651 }
 0x813   :  { %1267 = vrcp.f32 %v652_v11 }
 0x815   :  { %v575_v40 = vpop.xlane.xlu1 %574 }
 0x816   :  { %v576_v23 = vsel %vm172_vm4, %v575_v40, 0.0  ;;  %v655_v36 = vpop.xlane.xlu0 %654 }
 0x817   :  { %577 = vadd.xlane.f32.xlu1 %v576_v23  ;;  %1269 = vrcp.f32 %v655_v36 }
 0x818   :  { %1271 = vlog2.f32 %v1018_v49 }
 0x81b   :  { %896 = vadd.xlane.f32.xlu1 %v895_v25 }
 0x81c   :  { %v1264_v28 = vpop.eup %1263 }
 0x81d   :  { %v1266_v29 = vpop.eup %1265  ;;  %v679_v6 = vmul.f32 0.6931472, %v1264_v28 }
 0x81e   :  { %v681_v33 = vmul.f32 0.6931472, %v1266_v29 }
 0x81f   :  { %v682_v12 = vsub.f32 %v1647_v21, %v679_v6  ;;  %v1013_v21 = vshrl.u32 %v192_v37, 7 }
 0x820   :  { %v1268_v31 = vpop.eup %1267  ;;  %v683_v3 = vsub.f32 %v1617_v26, %v681_v33 }
 0x821   :  { %v657_v42 = vmul.f32 %v1268_v31, %v1651_v27  ;;  %vm1014_vm15 = vcmp.ne.s32.totalorder %v1013_v21, %v1371_v39 }
 0x822   :  { %v1090_v52 = vsel %vm1014_vm15, 1.0, %v1289_v58 }
 0x823   :  { %v684_v56 = vmul.f32 %v682_v12, %v657_v42 }
 0x824   :  { %v1270_v41 = vpop.eup %1269 }
 0x825   :  { %v659_v43 = vmul.f32 %v1270_v41, %v1656_v34  ;;  %v686_v45 = vsel %vm212_vm8, %v684_v56, 0.0  ;;  %v1272_v27 = vpop.eup %1271  ;;  %v838_v34 = vpop.permute.xlu0 %837 }
 0x826   :  { %v1020_v50 = vmul.f32 0.6931472, %v1272_v27  ;;  %v843_v35 = vsel %vm262_vm6, %v838_v34, 0.0 }
 0x827   :  { %v685_v44 = vmul.f32 %v683_v3, %v659_v43 }
 0x828   :  { %v1021_v26 = vsub.f32 0.0, %v1020_v50 }
 0x829   :  { %v687_v59 = vsel %vm212_vm8, %v685_v44, 0.0 }
 0x82a   :  { %v688_v46 = vadd.f32 %v687_v59, %v686_v45  ;;  %v1022_v55 = vmul.f32 %v1090_v52, %v1021_v26 }
 0x82c   :  { %689 = vadd.xlane.f32.xlu0 %v688_v46  ;;  %v1024_v54 = vsel %vm1023_vm0, %v1022_v55, 0.0 }
 0x850   :  { %v840_v38 = vpop.permute.xlu1 %839 }
 0x851   :  { %v844_v60 = vsel %vm262_vm6, %v840_v38, 0.0 }
 0x852   :  { %v845_v62 = vadd.f32 %v844_v60, %v843_v35 }
 0x854   :  { %846 = vadd.xlane.f32.xlu0 %v845_v62 }
 0x858   :  { %1025 = vadd.xlane.f32.xlu0 %v1024_v54 }
 0x8a0   :  { %v578_v30 = vpop.xlane.xlu1 %577 }
 0x8a1   :  { %v579_v37 = vrot.slane %v578_v30, 4 }
 0x8a3   :  { %v580_v53 = vadd.f32 %v579_v37, %v578_v30 }
 0x8a4   :  { %v897_v14 = vpop.xlane.xlu1 %896 }
 0x8a5   :  { %v581_v63 = vrot.slane %v580_v53, 2  ;;  %v898_v32 = vrot.slane %v897_v14, 4 }
 0x8a7   :  { %v582_v39 = vadd.f32 %v581_v63, %v580_v53  ;;  %v899_v61 = vadd.f32 %v898_v32, %v897_v14 }
 0x8a9   :  { %v583_v57 = vrot.slane %v582_v39, 1  ;;  %v900_v10 = vrot.slane %v899_v61, 2 }
 0x8ab   :  { %v584_v0 = vadd.f32 %v583_v57, %v582_v39  ;;  %v901_v47 = vadd.f32 %v900_v10, %v899_v61 }
 0x8ad   :  { %1170 = vpush %v584_v0  ;;  %v902_v16 = vrot.slane %v901_v47, 1 }
 0x8af   :  { %v903_v36 = vadd.f32 %v902_v16, %v901_v47 }
 0x8b5   :  { %v690_v58 = vpop.xlane.xlu0 %689 }
 0x8b6   :  { %v691_v2 = vrot.slane %v690_v58, 4 }
 0x8b8   :  { %v692_v7 = vadd.f32 %v691_v2, %v690_v58 }
 0x8ba   :  { %v693_v8 = vrot.slane %v692_v7, 2 }
 0x8bc   :  { %v694_v9 = vadd.f32 %v693_v8, %v692_v7 }
 0x8be   :  { %v695_v13 = vrot.slane %v694_v9, 1 }
 0x8c0   :  { %v696_v51 = vadd.f32 %v695_v13, %v694_v9 }
 0x8c2   :  { %1172 = vpush %v696_v51 }
 0x8dd   :  { %v847_v15 = vpop.xlane.xlu0 %846 }
 0x8de   :  { %v848_v17 = vrot.slane %v847_v15, 4  ;;  %s1171_s3 = spop %1170 }
 0x8df   :  { %s586_s15 = ssub.f32 0.0, %s1171_s3 }
 0x8e0   :  { %v849_v18 = vadd.f32 %v848_v17, %v847_v15 }
 0x8e1   :  { %v1026_v19 = vpop.xlane.xlu0 %1025  ;;  %s587_s18 = smul.f32 0.125, %s586_s15 }
 0x8e2   :  { %v850_v1 = vrot.slane %v849_v18, 2  ;;  %v1027_v5 = vrot.slane %v1026_v19, 4 }
 0x8e4   :  { %v1028_v4 = vadd.f32 %v1027_v5, %v1026_v19  ;;  %v851_v20 = vadd.f32 %v850_v1, %v849_v18 }
 0x8e6   :  { %v1029_v11 = vrot.slane %v1028_v4, 2  ;;  %v852_v22 = vrot.slane %v851_v20, 1 }
 0x8e8   :  { %v1030_v40 = vadd.f32 %v1029_v11, %v1028_v4  ;;  %v853_v23 = vadd.f32 %v852_v22, %v851_v20 }
 0x8ea   :  { %1174 = vpush %v853_v23  ;;  %v1031_v24 = vrot.slane %v1030_v40, 1 }
 0x8eb   :  { %1176 = vpush %v903_v36 }
 0x8ec   :  { %v1032_v25 = vadd.f32 %v1031_v24, %v1030_v40 }
 0x8ee   :  { %1178 = vpush %v1032_v25 }
 0x8f3   :  { %s1173_s16 = spop %1172 }
 0x8f4   :  { %s698_s17 = ssub.f32 0.0, %s1173_s16 }
 0x8f6   :  { %s699_s19 = smul.f32 0.0625, %s698_s17 }
 0x8f8   :  { %s700_s20 = sadd.f32 %s699_s19, %s587_s18 }
 0x8fa   :  { %s701_s21 = smul.f32 0.5, %s700_s20 }
 0x8fc   :  { %1049 = sst [smem:[#allocation2 + $0x2]] %s701_s21  ;;  %s1038_s0 = smul.f32 0.3, %s701_s21 }
 0x8fe   :  { %s1039_s6 = sadd.f32 %s1038_s0, %s1037_s25 }
 0x91b   :  { %s1175_s22 = spop %1174 }
 0x91c   :  { %s855_s23 = ssub.f32 0.0, %s1175_s22  ;;  %s1177_s24 = spop %1176 }
 0x91d   :  { %s905_s26 = ssub.f32 0.0, %s1177_s24 }
 0x91e   :  { %s856_s27 = smul.f32 0.0625, %s855_s23 }
 0x91f   :  { %s1179_s1 = spop %1178  ;;  %s906_s28 = smul.f32 0.25, %s905_s26 }
 0x920   :  { %1051 = sst [smem:[#allocation2 + $0x3]] %s856_s27  ;;  %s1034_s29 = smul.f32 0.083333336, %s1179_s1 }
 0x921   :  { %s1040_s30 = smul.f32 0.1, %s856_s27 }
 0x922   :  { %s1035_s5 = smul.f32 0.1, %s1034_s29 }
 0x923   :  { %s1041_s8 = sadd.f32 %s1040_s30, %s1039_s6 }
 0x924   :  { %s1036_s7 = sadd.f32 %s1035_s5, %s906_s28 }
 0x926   :  { %s1042_s12 = smul.f32 0.15, %s1036_s7  ;;  %1053 = sst [smem:[#allocation2 + $0x4]] %s1036_s7 }
 0x928   :  { %s1043_s13 = sadd.f32 %s1042_s12, %s1041_s8 }
 0x92a   :  { %1045 = sst [smem:[#allocation2]] %s1043_s13 }
 0x92b   :  { %1284 = shalt.err (!%p1281_p5)
}
 0x92c   :  { %s1293_s14 = smov [#allocation2]  }
 0x92d   :  { %1067 = dma.smem_to_vmem %s1293_s14, 16, %s1065_s11, [#allocation3]  }
 0x92e   :  { %1285 = dma.done.wait [#allocation3], 16  }
 0x92f   :  { %1286 = vsyncadd [#allocation3], 4294967280 }
 0x930   :  { %1075 = sfence }
 0x931   :  { %1076 = vsyncpa [#allocation3], 1 }

</bundles_post_ra>
